<compile_context>
chip_gen: v6e
topology: v6e:2x2x1
jax: 0.10.0
libtpu: 0.0.40
codegen_flags: <defaults>
</compile_context>

<pallas_src>
import jax
import jax.numpy as jnp
from jax import lax
from jax.experimental import pallas as pl
from jax.experimental.pallas import tpu as pltpu


def _make_conv_pool_kernel(H, W, Cin, Cout, NB):
    """Fused conv3x3(valid) + maxpool3x3/s3 (+bias) kernel for a block of NB images."""
    Hc, Wc = H - 2, W - 2
    Ho, Wo = Hc // 3, Wc // 3

    def kernel(x_ref, w_ref, b_ref, o_ref, rmax_ref):
        # x_ref:    (NB, H*W, 9*Cin)   im2col'd images (flat row m = h*W + w)
        # w_ref:    (9*Cin, Cout)      conv weights flattened (kh, kw, cin) -> rows
        # b_ref:    (1, Cout)          bias
        # o_ref:    (NB, Ho, Wo, Cout) pooled output block
        # rmax_ref: (W, Cout) f32      scratch for the kh-reduced conv row group
        wmat = w_ref[...]                      # hoisted: resident across all chunks
        bias = b_ref[...]                      # (1, Cout)

        for j in range(NB):                    # images in this batch block
            pooled_rows = []
            for i in range(Ho):                # one pooled output row per chunk
                m0 = 3 * i * W                 # static start; 8-aligned when W % 8 == 0
                # ---- conv: single MXU matmul for the 3 conv rows of pooled row i ----
                chunk = x_ref[j, m0:m0 + 3 * W, :]                        # (3W, 9Cin)
                conv = jnp.dot(chunk, wmat,
                               preferred_element_type=jnp.float32)        # (3W, Cout)
                # ---- pool stage 1 (kh): 3 contiguous row groups, VPU max ----
                rmax = jnp.maximum(jnp.maximum(conv[0:W], conv[W:2 * W]),
                                   conv[2 * W:3 * W])                      # (W, Cout)
                # ---- pool stage 2 (kw): 3 stride-3 loads from the tiny row-max ----
                rmax_ref[...] = rmax
                pooled = jnp.maximum(
                    jnp.maximum(rmax_ref[pl.ds(0, Wo, stride=3), :],
                                rmax_ref[pl.ds(1, Wo, stride=3), :]),
                    rmax_ref[pl.ds(2, Wo, stride=3), :])                   # (Wo, Cout)
                pooled_rows.append(pooled)
            # Bias commutes with max (per-channel constant, no activation in between),
            # so add it once per image after pooling; single store per image.
            img = jnp.stack(pooled_rows, axis=0) + bias[None]              # (Ho, Wo, Cout)
            o_ref[j] = img.astype(o_ref.dtype)

    return kernel


def _pick_batch_block(n):
    """Images per grid step: amortize per-step overhead but keep >=2 parallel steps."""
    for nb in (8, 4, 2):
        if n % nb == 0 and n // nb >= 2:
            return nb
    return 1


def conv_maxpool_layer(x_nhwc, w, b):
    """One Conv2d(k=3, stride=1, valid, +bias) + MaxPool2d(k=3, stride=3) block.

    x_nhwc: (N, H, W, Cin), w: (3, 3, Cin, Cout), b: (Cout,)  ->  (N, Ho, Wo, Cout)
    """
    N, H, W, Cin = x_nhwc.shape
    Cout = w.shape[-1]
    Hc, Wc = H - 2, W - 2
    Ho, Wo = Hc // 3, Wc // 3
    assert Ho >= 1 and Wo >= 1, "input too small for conv3 + pool3"

    # Layout plumbing (outside the kernel, fused by XLA): im2col over (kh, kw) with the
    # column index spanning the full W, so conv position (h, w) lives at flat row h*W + w
    # and the lane dim carries all 9*Cin tap-channels (lane-dense vs. Cin = 4..16).
    xp = jnp.pad(x_nhwc, ((0, 0), (0, 2), (0, 2), (0, 0)))
    taps = [xp[:, kh:kh + H, kw:kw + W, :] for kh in range(3) for kw in range(3)]
    x_im2col = jnp.concatenate(taps, axis=-1).reshape(N, H * W, 9 * Cin)

    w_flat = w.reshape(9 * Cin, Cout)        # (kh, kw, cin) order matches im2col lanes
    b2 = b.reshape(1, Cout)

    NB = _pick_batch_block(N)
    kernel = _make_conv_pool_kernel(H, W, Cin, Cout, NB)
    return pl.pallas_call(
        kernel,
        out_shape=jax.ShapeDtypeStruct((N, Ho, Wo, Cout), x_nhwc.dtype),
        grid_spec=pltpu.PrefetchScalarGridSpec(
            num_scalar_prefetch=0,
            grid=(N // NB,),
            in_specs=[
                pl.BlockSpec((NB, H * W, 9 * Cin), lambda n: (n, 0, 0)),
                pl.BlockSpec((9 * Cin, Cout), lambda n: (0, 0)),
                pl.BlockSpec((1, Cout), lambda n: (0, 0)),
            ],
            out_specs=pl.BlockSpec((NB, Ho, Wo, Cout), lambda n: (n, 0, 0, 0)),
            scratch_shapes=[pltpu.VMEM((W, Cout), jnp.float32)],
        ),
        compiler_params=pltpu.CompilerParams(
            dimension_semantics=("parallel",),
            # im2col tile is NB * H*W * 128(lane-padded) * 4 B, double-buffered; at the
            # NB cap of 8 this stays ~8 MiB, well inside every chip's scoped VMEM
            # (32 MiB is the v6e/v7x default and safely below v5e/v6e/v7x physical).
            vmem_limit_bytes=32 * 1024 * 1024,
        ),
    )(x_im2col, w_flat, b2)


def init_params(key, input_channels, n_channels):
    """Deterministic parameter init (PyTorch weight layout: (Cout, Cin, 3, 3))."""
    params = []
    cin = input_channels
    for cout in n_channels:
        key, kw_, kb = jax.random.split(key, 3)
        w = 0.1 * jax.random.normal(kw_, (cout, cin, 3, 3), jnp.float32)
        b = 0.1 * jax.random.normal(kb, (cout,), jnp.float32)
        params.append((w, b))
        cin = cout
    return params


def conv_maxpool_forward(x_nchw, params):
    """Full ConvMaxPool forward. Input/output are NCHW like PyTorch."""
    x = jnp.transpose(x_nchw, (0, 2, 3, 1))                 # NCHW -> NHWC (glue)
    for w, b in params:
        w_k = jnp.transpose(w, (2, 3, 1, 0))                # (Cout,Cin,3,3) -> (3,3,Cin,Cout)
        x = conv_maxpool_layer(x, w_k, b)
    return jnp.transpose(x, (0, 3, 1, 2))                   # NHWC -> NCHW


def reference_forward(x_nchw, params):
    """Pure-JAX reference for correctness checking."""
    x = x_nchw
    for w, b in params:
        y = lax.conv_general_dilated(x, w, (1, 1), 'VALID',
                                     dimension_numbers=('NCHW', 'OIHW', 'NCHW'))
        y = y + b[None, :, None, None]
        y = lax.reduce_window(y, -jnp.inf, lax.max,
                              (1, 1, 3, 3), (1, 1, 3, 3), 'VALID')
        x = y
    return x


if __name__ == "__main__":
    key = jax.random.PRNGKey(0)
    kx, kp = jax.random.split(key)

    input_channels = 4
    n_channels = [8, 16]
    # 32x32 so that two (conv k=3 -> pool k=3,s=3) blocks stay non-degenerate:
    # 32 -> 30 -> 10 -> 8 -> 2   (and W=32 keeps every conv-chunk start 8-aligned)
    x = jax.random.normal(kx, (2, input_channels, 32, 32), jnp.float32)
    params = init_params(kp, input_channels, n_channels)

    fwd = jax.jit(conv_maxpool_forward)
    out = jax.block_until_ready(fwd(x, params))
    ref = reference_forward(x, params)

    assert out.shape == (2, n_channels[-1], 2, 2), out.shape
    max_err = jnp.max(jnp.abs(out - ref))
    assert max_err < 1e-4, f"max abs error too large: {max_err}"

    print("KERNEL_OK")
</pallas_src>

<mosaic_0001>
module attributes {stable_mosaic.version = 11 : i64} {
  func.func @kernel(%arg0: i32, %arg1: memref<1x1024x36xf32, #tpu.memory_space<vmem>>, %arg2: memref<36x8xf32, #tpu.memory_space<vmem>>, %arg3: memref<1x8xf32, #tpu.memory_space<vmem>>, %arg4: memref<1x10x10x8xf32, #tpu.memory_space<vmem>>, %arg5: memref<32x8xf32, #tpu.memory_space<vmem>>) attributes {dimension_semantics = [#tpu.dimension_semantics<parallel>], iteration_bounds = array<i64: 2>, scalar_prefetch = 0 : i64, scratch_operands = 1 : i64, tpu.core_type = #tpu.core_type<tc>, window_params = [{transform_indices = @transform_0, window_bounds = array<i64: 1, 1024, 36>}, {pipeline_mode = #tpu.pipeline_mode<synchronous>, transform_indices = @transform_1, window_bounds = array<i64: 36, 8>}, {pipeline_mode = #tpu.pipeline_mode<synchronous>, transform_indices = @transform_2, window_bounds = array<i64: 1, 8>}, {transform_indices = @transform_3, window_bounds = array<i64: 1, 10, 10, 8>}]} {
    %c0 = arith.constant 0 : index
    %c0_0 = arith.constant 0 : index
    %0 = vector.load %arg2[%c0, %c0_0] : memref<36x8xf32, #tpu.memory_space<vmem>>, vector<36x8xf32>
    %c0_1 = arith.constant 0 : index
    %c0_2 = arith.constant 0 : index
    %1 = vector.load %arg3[%c0_1, %c0_2] : memref<1x8xf32, #tpu.memory_space<vmem>>, vector<1x8xf32>
    %c0_3 = arith.constant 0 : index
    %c0_4 = arith.constant 0 : index
    %c0_5 = arith.constant 0 : index
    %2 = vector.load %arg1[%c0_3, %c0_4, %c0_5] : memref<1x1024x36xf32, #tpu.memory_space<vmem>>, vector<1x96x36xf32>
    %3 = vector.shape_cast %2 : vector<1x96x36xf32> to vector<96x36xf32>
    %cst = arith.constant dense<0.000000e+00> : vector<96x8xf32>
    %4 = tpu.matmul %3, %0, %cst {dimension_numbers = #tpu.dot_dimension_numbers<[1], [0], [0], [1], [0, 0, 1, 1], [], []>} : vector<96x36xf32>, vector<36x8xf32>, vector<96x8xf32> -> vector<96x8xf32>
    %5 = vector.extract_strided_slice %4 {offsets = [0, 0], sizes = [32, 8], strides = [1, 1]} : vector<96x8xf32> to vector<32x8xf32>
    %6 = vector.extract_strided_slice %4 {offsets = [32, 0], sizes = [32, 8], strides = [1, 1]} : vector<96x8xf32> to vector<32x8xf32>
    %7 = arith.maximumf %5, %6 : vector<32x8xf32>
    %8 = vector.extract_strided_slice %4 {offsets = [64, 0], sizes = [32, 8], strides = [1, 1]} : vector<96x8xf32> to vector<32x8xf32>
    %9 = arith.maximumf %7, %8 : vector<32x8xf32>
    %c0_6 = arith.constant 0 : index
    %c0_7 = arith.constant 0 : index
    %10 = vector.load %arg5[%c0_6, %c0_7] : memref<32x8xf32, #tpu.memory_space<vmem>>, vector<32x8xf32>
    tpu.vector_store %arg5[%c0_6, %c0_7], %9 {strides = array<i32>} : memref<32x8xf32, #tpu.memory_space<vmem>>, vector<32x8xf32>,
    %c0_8 = arith.constant 0 : index
    %c0_9 = arith.constant 0 : index
    %11 = tpu.strided_load %arg5[%c0_8, %c0_9] {strides = array<i32: 3, 1>} : memref<32x8xf32, #tpu.memory_space<vmem>>, vector<10x8xf32>
    %c1 = arith.constant 1 : index
    %c0_10 = arith.constant 0 : index
    %12 = tpu.strided_load %arg5[%c1, %c0_10] {strides = array<i32: 3, 1>} : memref<32x8xf32, #tpu.memory_space<vmem>>, vector<10x8xf32>
    %13 = arith.maximumf %11, %12 : vector<10x8xf32>
    %c2 = arith.constant 2 : index
    %c0_11 = arith.constant 0 : index
    %14 = tpu.strided_load %arg5[%c2, %c0_11] {strides = array<i32: 3, 1>} : memref<32x8xf32, #tpu.memory_space<vmem>>, vector<10x8xf32>
    %15 = arith.maximumf %13, %14 : vector<10x8xf32>
    %c0_12 = arith.constant 0 : index
    %c96 = arith.constant 96 : index
    %c0_13 = arith.constant 0 : index
    %16 = vector.load %arg1[%c0_12, %c96, %c0_13] : memref<1x1024x36xf32, #tpu.memory_space<vmem>>, vector<1x96x36xf32>
    %17 = vector.shape_cast %16 : vector<1x96x36xf32> to vector<96x36xf32>
    %cst_14 = arith.constant dense<0.000000e+00> : vector<96x8xf32>
    %18 = tpu.matmul %17, %0, %cst_14 {dimension_numbers = #tpu.dot_dimension_numbers<[1], [0], [0], [1], [0, 0, 1, 1], [], []>} : vector<96x36xf32>, vector<36x8xf32>, vector<96x8xf32> -> vector<96x8xf32>
    %19 = vector.extract_strided_slice %18 {offsets = [0, 0], sizes = [32, 8], strides = [1, 1]} : vector<96x8xf32> to vector<32x8xf32>
    %20 = vector.extract_strided_slice %18 {offsets = [32, 0], sizes = [32, 8], strides = [1, 1]} : vector<96x8xf32> to vector<32x8xf32>
    %21 = arith.maximumf %19, %20 : vector<32x8xf32>
    %22 = vector.extract_strided_slice %18 {offsets = [64, 0], sizes = [32, 8], strides = [1, 1]} : vector<96x8xf32> to vector<32x8xf32>
    %23 = arith.maximumf %21, %22 : vector<32x8xf32>
    %c0_15 = arith.constant 0 : index
    %c0_16 = arith.constant 0 : index
    %24 = vector.load %arg5[%c0_15, %c0_16] : memref<32x8xf32, #tpu.memory_space<vmem>>, vector<32x8xf32>
    tpu.vector_store %arg5[%c0_15, %c0_16], %23 {strides = array<i32>} : memref<32x8xf32, #tpu.memory_space<vmem>>, vector<32x8xf32>,
    %c0_17 = arith.constant 0 : index
    %c0_18 = arith.constant 0 : index
    %25 = tpu.strided_load %arg5[%c0_17, %c0_18] {strides = array<i32: 3, 1>} : memref<32x8xf32, #tpu.memory_space<vmem>>, vector<10x8xf32>
    %c1_19 = arith.constant 1 : index
    %c0_20 = arith.constant 0 : index
    %26 = tpu.strided_load %arg5[%c1_19, %c0_20] {strides = array<i32: 3, 1>} : memref<32x8xf32, #tpu.memory_space<vmem>>, vector<10x8xf32>
    %27 = arith.maximumf %25, %26 : vector<10x8xf32>
    %c2_21 = arith.constant 2 : index
    %c0_22 = arith.constant 0 : index
    %28 = tpu.strided_load %arg5[%c2_21, %c0_22] {strides = array<i32: 3, 1>} : memref<32x8xf32, #tpu.memory_space<vmem>>, vector<10x8xf32>
    %29 = arith.maximumf %27, %28 : vector<10x8xf32>
    %c0_23 = arith.constant 0 : index
    %c192 = arith.constant 192 : index
    %c0_24 = arith.constant 0 : index
    %30 = vector.load %arg1[%c0_23, %c192, %c0_24] : memref<1x1024x36xf32, #tpu.memory_space<vmem>>, vector<1x96x36xf32>
    %31 = vector.shape_cast %30 : vector<1x96x36xf32> to vector<96x36xf32>
    %cst_25 = arith.constant dense<0.000000e+00> : vector<96x8xf32>
    %32 = tpu.matmul %31, %0, %cst_25 {dimension_numbers = #tpu.dot_dimension_numbers<[1], [0], [0], [1], [0, 0, 1, 1], [], []>} : vector<96x36xf32>, vector<36x8xf32>, vector<96x8xf32> -> vector<96x8xf32>
    %33 = vector.extract_strided_slice %32 {offsets = [0, 0], sizes = [32, 8], strides = [1, 1]} : vector<96x8xf32> to vector<32x8xf32>
    %34 = vector.extract_strided_slice %32 {offsets = [32, 0], sizes = [32, 8], strides = [1, 1]} : vector<96x8xf32> to vector<32x8xf32>
    %35 = arith.maximumf %33, %34 : vector<32x8xf32>
    %36 = vector.extract_strided_slice %32 {offsets = [64, 0], sizes = [32, 8], strides = [1, 1]} : vector<96x8xf32> to vector<32x8xf32>
    %37 = arith.maximumf %35, %36 : vector<32x8xf32>
    %c0_26 = arith.constant 0 : index
    %c0_27 = arith.constant 0 : index
    %38 = vector.load %arg5[%c0_26, %c0_27] : memref<32x8xf32, #tpu.memory_space<vmem>>, vector<32x8xf32>
    tpu.vector_store %arg5[%c0_26, %c0_27], %37 {strides = array<i32>} : memref<32x8xf32, #tpu.memory_space<vmem>>, vector<32x8xf32>,
    %c0_28 = arith.constant 0 : index
    %c0_29 = arith.constant 0 : index
    %39 = tpu.strided_load %arg5[%c0_28, %c0_29] {strides = array<i32: 3, 1>} : memref<32x8xf32, #tpu.memory_space<vmem>>, vector<10x8xf32>
    %c1_30 = arith.constant 1 : index
    %c0_31 = arith.constant 0 : index
    %40 = tpu.strided_load %arg5[%c1_30, %c0_31] {strides = array<i32: 3, 1>} : memref<32x8xf32, #tpu.memory_space<vmem>>, vector<10x8xf32>
    %41 = arith.maximumf %39, %40 : vector<10x8xf32>
    %c2_32 = arith.constant 2 : index
    %c0_33 = arith.constant 0 : index
    %42 = tpu.strided_load %arg5[%c2_32, %c0_33] {strides = array<i32: 3, 1>} : memref<32x8xf32, #tpu.memory_space<vmem>>, vector<10x8xf32>
    %43 = arith.maximumf %41, %42 : vector<10x8xf32>
    %c0_34 = arith.constant 0 : index
    %c288 = arith.constant 288 : index
    %c0_35 = arith.constant 0 : index
    %44 = vector.load %arg1[%c0_34, %c288, %c0_35] : memref<1x1024x36xf32, #tpu.memory_space<vmem>>, vector<1x96x36xf32>
    %45 = vector.shape_cast %44 : vector<1x96x36xf32> to vector<96x36xf32>
    %cst_36 = arith.constant dense<0.000000e+00> : vector<96x8xf32>
    %46 = tpu.matmul %45, %0, %cst_36 {dimension_numbers = #tpu.dot_dimension_numbers<[1], [0], [0], [1], [0, 0, 1, 1], [], []>} : vector<96x36xf32>, vector<36x8xf32>, vector<96x8xf32> -> vector<96x8xf32>
    %47 = vector.extract_strided_slice %46 {offsets = [0, 0], sizes = [32, 8], strides = [1, 1]} : vector<96x8xf32> to vector<32x8xf32>
    %48 = vector.extract_strided_slice %46 {offsets = [32, 0], sizes = [32, 8], strides = [1, 1]} : vector<96x8xf32> to vector<32x8xf32>
    %49 = arith.maximumf %47, %48 : vector<32x8xf32>
    %50 = vector.extract_strided_slice %46 {offsets = [64, 0], sizes = [32, 8], strides = [1, 1]} : vector<96x8xf32> to vector<32x8xf32>
    %51 = arith.maximumf %49, %50 : vector<32x8xf32>
    %c0_37 = arith.constant 0 : index
    %c0_38 = arith.constant 0 : index
    %52 = vector.load %arg5[%c0_37, %c0_38] : memref<32x8xf32, #tpu.memory_space<vmem>>, vector<32x8xf32>
    tpu.vector_store %arg5[%c0_37, %c0_38], %51 {strides = array<i32>} : memref<32x8xf32, #tpu.memory_space<vmem>>, vector<32x8xf32>,
    %c0_39 = arith.constant 0 : index
    %c0_40 = arith.constant 0 : index
    %53 = tpu.strided_load %arg5[%c0_39, %c0_40] {strides = array<i32: 3, 1>} : memref<32x8xf32, #tpu.memory_space<vmem>>, vector<10x8xf32>
    %c1_41 = arith.constant 1 : index
    %c0_42 = arith.constant 0 : index
    %54 = tpu.strided_load %arg5[%c1_41, %c0_42] {strides = array<i32: 3, 1>} : memref<32x8xf32, #tpu.memory_space<vmem>>, vector<10x8xf32>
    %55 = arith.maximumf %53, %54 : vector<10x8xf32>
    %c2_43 = arith.constant 2 : index
    %c0_44 = arith.constant 0 : index
    %56 = tpu.strided_load %arg5[%c2_43, %c0_44] {strides = array<i32: 3, 1>} : memref<32x8xf32, #tpu.memory_space<vmem>>, vector<10x8xf32>
    %57 = arith.maximumf %55, %56 : vector<10x8xf32>
    %c0_45 = arith.constant 0 : index
    %c384 = arith.constant 384 : index
    %c0_46 = arith.constant 0 : index
    %58 = vector.load %arg1[%c0_45, %c384, %c0_46] : memref<1x1024x36xf32, #tpu.memory_space<vmem>>, vector<1x96x36xf32>
    %59 = vector.shape_cast %58 : vector<1x96x36xf32> to vector<96x36xf32>
    %cst_47 = arith.constant dense<0.000000e+00> : vector<96x8xf32>
    %60 = tpu.matmul %59, %0, %cst_47 {dimension_numbers = #tpu.dot_dimension_numbers<[1], [0], [0], [1], [0, 0, 1, 1], [], []>} : vector<96x36xf32>, vector<36x8xf32>, vector<96x8xf32> -> vector<96x8xf32>
    %61 = vector.extract_strided_slice %60 {offsets = [0, 0], sizes = [32, 8], strides = [1, 1]} : vector<96x8xf32> to vector<32x8xf32>
    %62 = vector.extract_strided_slice %60 {offsets = [32, 0], sizes = [32, 8], strides = [1, 1]} : vector<96x8xf32> to vector<32x8xf32>
    %63 = arith.maximumf %61, %62 : vector<32x8xf32>
    %64 = vector.extract_strided_slice %60 {offsets = [64, 0], sizes = [32, 8], strides = [1, 1]} : vector<96x8xf32> to vector<32x8xf32>
    %65 = arith.maximumf %63, %64 : vector<32x8xf32>
    %c0_48 = arith.constant 0 : index
    %c0_49 = arith.constant 0 : index
    %66 = vector.load %arg5[%c0_48, %c0_49] : memref<32x8xf32, #tpu.memory_space<vmem>>, vector<32x8xf32>
    tpu.vector_store %arg5[%c0_48, %c0_49], %65 {strides = array<i32>} : memref<32x8xf32, #tpu.memory_space<vmem>>, vector<32x8xf32>,
    %c0_50 = arith.constant 0 : index
    %c0_51 = arith.constant 0 : index
    %67 = tpu.strided_load %arg5[%c0_50, %c0_51] {strides = array<i32: 3, 1>} : memref<32x8xf32, #tpu.memory_space<vmem>>, vector<10x8xf32>
    %c1_52 = arith.constant 1 : index
    %c0_53 = arith.constant 0 : index
    %68 = tpu.strided_load %arg5[%c1_52, %c0_53] {strides = array<i32: 3, 1>} : memref<32x8xf32, #tpu.memory_space<vmem>>, vector<10x8xf32>
    %69 = arith.maximumf %67, %68 : vector<10x8xf32>
    %c2_54 = arith.constant 2 : index
    %c0_55 = arith.constant 0 : index
    %70 = tpu.strided_load %arg5[%c2_54, %c0_55] {strides = array<i32: 3, 1>} : memref<32x8xf32, #tpu.memory_space<vmem>>, vector<10x8xf32>
    %71 = arith.maximumf %69, %70 : vector<10x8xf32>
    %c0_56 = arith.constant 0 : index
    %c480 = arith.constant 480 : index
    %c0_57 = arith.constant 0 : index
    %72 = vector.load %arg1[%c0_56, %c480, %c0_57] : memref<1x1024x36xf32, #tpu.memory_space<vmem>>, vector<1x96x36xf32>
    %73 = vector.shape_cast %72 : vector<1x96x36xf32> to vector<96x36xf32>
    %cst_58 = arith.constant dense<0.000000e+00> : vector<96x8xf32>
    %74 = tpu.matmul %73, %0, %cst_58 {dimension_numbers = #tpu.dot_dimension_numbers<[1], [0], [0], [1], [0, 0, 1, 1], [], []>} : vector<96x36xf32>, vector<36x8xf32>, vector<96x8xf32> -> vector<96x8xf32>
    %75 = vector.extract_strided_slice %74 {offsets = [0, 0], sizes = [32, 8], strides = [1, 1]} : vector<96x8xf32> to vector<32x8xf32>
    %76 = vector.extract_strided_slice %74 {offsets = [32, 0], sizes = [32, 8], strides = [1, 1]} : vector<96x8xf32> to vector<32x8xf32>
    %77 = arith.maximumf %75, %76 : vector<32x8xf32>
    %78 = vector.extract_strided_slice %74 {offsets = [64, 0], sizes = [32, 8], strides = [1, 1]} : vector<96x8xf32> to vector<32x8xf32>
    %79 = arith.maximumf %77, %78 : vector<32x8xf32>
    %c0_59 = arith.constant 0 : index
    %c0_60 = arith.constant 0 : index
    %80 = vector.load %arg5[%c0_59, %c0_60] : memref<32x8xf32, #tpu.memory_space<vmem>>, vector<32x8xf32>
    tpu.vector_store %arg5[%c0_59, %c0_60], %79 {strides = array<i32>} : memref<32x8xf32, #tpu.memory_space<vmem>>, vector<32x8xf32>,
    %c0_61 = arith.constant 0 : index
    %c0_62 = arith.constant 0 : index
    %81 = tpu.strided_load %arg5[%c0_61, %c0_62] {strides = array<i32: 3, 1>} : memref<32x8xf32, #tpu.memory_space<vmem>>, vector<10x8xf32>
    %c1_63 = arith.constant 1 : index
    %c0_64 = arith.constant 0 : index
    %82 = tpu.strided_load %arg5[%c1_63, %c0_64] {strides = array<i32: 3, 1>} : memref<32x8xf32, #tpu.memory_space<vmem>>, vector<10x8xf32>
    %83 = arith.maximumf %81, %82 : vector<10x8xf32>
    %c2_65 = arith.constant 2 : index
    %c0_66 = arith.constant 0 : index
    %84 = tpu.strided_load %arg5[%c2_65, %c0_66] {strides = array<i32: 3, 1>} : memref<32x8xf32, #tpu.memory_space<vmem>>, vector<10x8xf32>
    %85 = arith.maximumf %83, %84 : vector<10x8xf32>
    %c0_67 = arith.constant 0 : index
    %c576 = arith.constant 576 : index
    %c0_68 = arith.constant 0 : index
    %86 = vector.load %arg1[%c0_67, %c576, %c0_68] : memref<1x1024x36xf32, #tpu.memory_space<vmem>>, vector<1x96x36xf32>
    %87 = vector.shape_cast %86 : vector<1x96x36xf32> to vector<96x36xf32>
    %cst_69 = arith.constant dense<0.000000e+00> : vector<96x8xf32>
    %88 = tpu.matmul %87, %0, %cst_69 {dimension_numbers = #tpu.dot_dimension_numbers<[1], [0], [0], [1], [0, 0, 1, 1], [], []>} : vector<96x36xf32>, vector<36x8xf32>, vector<96x8xf32> -> vector<96x8xf32>
    %89 = vector.extract_strided_slice %88 {offsets = [0, 0], sizes = [32, 8], strides = [1, 1]} : vector<96x8xf32> to vector<32x8xf32>
    %90 = vector.extract_strided_slice %88 {offsets = [32, 0], sizes = [32, 8], strides = [1, 1]} : vector<96x8xf32> to vector<32x8xf32>
    %91 = arith.maximumf %89, %90 : vector<32x8xf32>
    %92 = vector.extract_strided_slice %88 {offsets = [64, 0], sizes = [32, 8], strides = [1, 1]} : vector<96x8xf32> to vector<32x8xf32>
    %93 = arith.maximumf %91, %92 : vector<32x8xf32>
    %c0_70 = arith.constant 0 : index
    %c0_71 = arith.constant 0 : index
    %94 = vector.load %arg5[%c0_70, %c0_71] : memref<32x8xf32, #tpu.memory_space<vmem>>, vector<32x8xf32>
    tpu.vector_store %arg5[%c0_70, %c0_71], %93 {strides = array<i32>} : memref<32x8xf32, #tpu.memory_space<vmem>>, vector<32x8xf32>,
    %c0_72 = arith.constant 0 : index
    %c0_73 = arith.constant 0 : index
    %95 = tpu.strided_load %arg5[%c0_72, %c0_73] {strides = array<i32: 3, 1>} : memref<32x8xf32, #tpu.memory_space<vmem>>, vector<10x8xf32>
    %c1_74 = arith.constant 1 : index
    %c0_75 = arith.constant 0 : index
    %96 = tpu.strided_load %arg5[%c1_74, %c0_75] {strides = array<i32: 3, 1>} : memref<32x8xf32, #tpu.memory_space<vmem>>, vector<10x8xf32>
    %97 = arith.maximumf %95, %96 : vector<10x8xf32>
    %c2_76 = arith.constant 2 : index
    %c0_77 = arith.constant 0 : index
    %98 = tpu.strided_load %arg5[%c2_76, %c0_77] {strides = array<i32: 3, 1>} : memref<32x8xf32, #tpu.memory_space<vmem>>, vector<10x8xf32>
    %99 = arith.maximumf %97, %98 : vector<10x8xf32>
    %c0_78 = arith.constant 0 : index
    %c672 = arith.constant 672 : index
    %c0_79 = arith.constant 0 : index
    %100 = vector.load %arg1[%c0_78, %c672, %c0_79] : memref<1x1024x36xf32, #tpu.memory_space<vmem>>, vector<1x96x36xf32>
    %101 = vector.shape_cast %100 : vector<1x96x36xf32> to vector<96x36xf32>
    %cst_80 = arith.constant dense<0.000000e+00> : vector<96x8xf32>
    %102 = tpu.matmul %101, %0, %cst_80 {dimension_numbers = #tpu.dot_dimension_numbers<[1], [0], [0], [1], [0, 0, 1, 1], [], []>} : vector<96x36xf32>, vector<36x8xf32>, vector<96x8xf32> -> vector<96x8xf32>
    %103 = vector.extract_strided_slice %102 {offsets = [0, 0], sizes = [32, 8], strides = [1, 1]} : vector<96x8xf32> to vector<32x8xf32>
    %104 = vector.extract_strided_slice %102 {offsets = [32, 0], sizes = [32, 8], strides = [1, 1]} : vector<96x8xf32> to vector<32x8xf32>
    %105 = arith.maximumf %103, %104 : vector<32x8xf32>
    %106 = vector.extract_strided_slice %102 {offsets = [64, 0], sizes = [32, 8], strides = [1, 1]} : vector<96x8xf32> to vector<32x8xf32>
    %107 = arith.maximumf %105, %106 : vector<32x8xf32>
    %c0_81 = arith.constant 0 : index
    %c0_82 = arith.constant 0 : index
    %108 = vector.load %arg5[%c0_81, %c0_82] : memref<32x8xf32, #tpu.memory_space<vmem>>, vector<32x8xf32>
    tpu.vector_store %arg5[%c0_81, %c0_82], %107 {strides = array<i32>} : memref<32x8xf32, #tpu.memory_space<vmem>>, vector<32x8xf32>,
    %c0_83 = arith.constant 0 : index
    %c0_84 = arith.constant 0 : index
    %109 = tpu.strided_load %arg5[%c0_83, %c0_84] {strides = array<i32: 3, 1>} : memref<32x8xf32, #tpu.memory_space<vmem>>, vector<10x8xf32>
    %c1_85 = arith.constant 1 : index
    %c0_86 = arith.constant 0 : index
    %110 = tpu.strided_load %arg5[%c1_85, %c0_86] {strides = array<i32: 3, 1>} : memref<32x8xf32, #tpu.memory_space<vmem>>, vector<10x8xf32>
    %111 = arith.maximumf %109, %110 : vector<10x8xf32>
    %c2_87 = arith.constant 2 : index
    %c0_88 = arith.constant 0 : index
    %112 = tpu.strided_load %arg5[%c2_87, %c0_88] {strides = array<i32: 3, 1>} : memref<32x8xf32, #tpu.memory_space<vmem>>, vector<10x8xf32>
    %113 = arith.maximumf %111, %112 : vector<10x8xf32>
    %c0_89 = arith.constant 0 : index
    %c768 = arith.constant 768 : index
    %c0_90 = arith.constant 0 : index
    %114 = vector.load %arg1[%c0_89, %c768, %c0_90] : memref<1x1024x36xf32, #tpu.memory_space<vmem>>, vector<1x96x36xf32>
    %115 = vector.shape_cast %114 : vector<1x96x36xf32> to vector<96x36xf32>
    %cst_91 = arith.constant dense<0.000000e+00> : vector<96x8xf32>
    %116 = tpu.matmul %115, %0, %cst_91 {dimension_numbers = #tpu.dot_dimension_numbers<[1], [0], [0], [1], [0, 0, 1, 1], [], []>} : vector<96x36xf32>, vector<36x8xf32>, vector<96x8xf32> -> vector<96x8xf32>
    %117 = vector.extract_strided_slice %116 {offsets = [0, 0], sizes = [32, 8], strides = [1, 1]} : vector<96x8xf32> to vector<32x8xf32>
    %118 = vector.extract_strided_slice %116 {offsets = [32, 0], sizes = [32, 8], strides = [1, 1]} : vector<96x8xf32> to vector<32x8xf32>
    %119 = arith.maximumf %117, %118 : vector<32x8xf32>
    %120 = vector.extract_strided_slice %116 {offsets = [64, 0], sizes = [32, 8], strides = [1, 1]} : vector<96x8xf32> to vector<32x8xf32>
    %121 = arith.maximumf %119, %120 : vector<32x8xf32>
    %c0_92 = arith.constant 0 : index
    %c0_93 = arith.constant 0 : index
    %122 = vector.load %arg5[%c0_92, %c0_93] : memref<32x8xf32, #tpu.memory_space<vmem>>, vector<32x8xf32>
    tpu.vector_store %arg5[%c0_92, %c0_93], %121 {strides = array<i32>} : memref<32x8xf32, #tpu.memory_space<vmem>>, vector<32x8xf32>,
    %c0_94 = arith.constant 0 : index
    %c0_95 = arith.constant 0 : index
    %123 = tpu.strided_load %arg5[%c0_94, %c0_95] {strides = array<i32: 3, 1>} : memref<32x8xf32, #tpu.memory_space<vmem>>, vector<10x8xf32>
    %c1_96 = arith.constant 1 : index
    %c0_97 = arith.constant 0 : index
    %124 = tpu.strided_load %arg5[%c1_96, %c0_97] {strides = array<i32: 3, 1>} : memref<32x8xf32, #tpu.memory_space<vmem>>, vector<10x8xf32>
    %125 = arith.maximumf %123, %124 : vector<10x8xf32>
    %c2_98 = arith.constant 2 : index
    %c0_99 = arith.constant 0 : index
    %126 = tpu.strided_load %arg5[%c2_98, %c0_99] {strides = array<i32: 3, 1>} : memref<32x8xf32, #tpu.memory_space<vmem>>, vector<10x8xf32>
    %127 = arith.maximumf %125, %126 : vector<10x8xf32>
    %c0_100 = arith.constant 0 : index
    %c864 = arith.constant 864 : index
    %c0_101 = arith.constant 0 : index
    %128 = vector.load %arg1[%c0_100, %c864, %c0_101] : memref<1x1024x36xf32, #tpu.memory_space<vmem>>, vector<1x96x36xf32>
    %129 = vector.shape_cast %128 : vector<1x96x36xf32> to vector<96x36xf32>
    %cst_102 = arith.constant dense<0.000000e+00> : vector<96x8xf32>
    %130 = tpu.matmul %129, %0, %cst_102 {dimension_numbers = #tpu.dot_dimension_numbers<[1], [0], [0], [1], [0, 0, 1, 1], [], []>} : vector<96x36xf32>, vector<36x8xf32>, vector<96x8xf32> -> vector<96x8xf32>
    %131 = vector.extract_strided_slice %130 {offsets = [0, 0], sizes = [32, 8], strides = [1, 1]} : vector<96x8xf32> to vector<32x8xf32>
    %132 = vector.extract_strided_slice %130 {offsets = [32, 0], sizes = [32, 8], strides = [1, 1]} : vector<96x8xf32> to vector<32x8xf32>
    %133 = arith.maximumf %131, %132 : vector<32x8xf32>
    %134 = vector.extract_strided_slice %130 {offsets = [64, 0], sizes = [32, 8], strides = [1, 1]} : vector<96x8xf32> to vector<32x8xf32>
    %135 = arith.maximumf %133, %134 : vector<32x8xf32>
    %c0_103 = arith.constant 0 : index
    %c0_104 = arith.constant 0 : index
    %136 = vector.load %arg5[%c0_103, %c0_104] : memref<32x8xf32, #tpu.memory_space<vmem>>, vector<32x8xf32>
    tpu.vector_store %arg5[%c0_103, %c0_104], %135 {strides = array<i32>} : memref<32x8xf32, #tpu.memory_space<vmem>>, vector<32x8xf32>,
    %c0_105 = arith.constant 0 : index
    %c0_106 = arith.constant 0 : index
    %137 = tpu.strided_load %arg5[%c0_105, %c0_106] {strides = array<i32: 3, 1>} : memref<32x8xf32, #tpu.memory_space<vmem>>, vector<10x8xf32>
    %c1_107 = arith.constant 1 : index
    %c0_108 = arith.constant 0 : index
    %138 = tpu.strided_load %arg5[%c1_107, %c0_108] {strides = array<i32: 3, 1>} : memref<32x8xf32, #tpu.memory_space<vmem>>, vector<10x8xf32>
    %139 = arith.maximumf %137, %138 : vector<10x8xf32>
    %c2_109 = arith.constant 2 : index
    %c0_110 = arith.constant 0 : index
    %140 = tpu.strided_load %arg5[%c2_109, %c0_110] {strides = array<i32: 3, 1>} : memref<32x8xf32, #tpu.memory_space<vmem>>, vector<10x8xf32>
    %141 = arith.maximumf %139, %140 : vector<10x8xf32>
    %142 = vector.shape_cast %15 : vector<10x8xf32> to vector<1x10x8xf32>
    %143 = vector.shape_cast %29 : vector<10x8xf32> to vector<1x10x8xf32>
    %144 = vector.shape_cast %43 : vector<10x8xf32> to vector<1x10x8xf32>
    %145 = vector.shape_cast %57 : vector<10x8xf32> to vector<1x10x8xf32>
    %146 = vector.shape_cast %71 : vector<10x8xf32> to vector<1x10x8xf32>
    %147 = vector.shape_cast %85 : vector<10x8xf32> to vector<1x10x8xf32>
    %148 = vector.shape_cast %99 : vector<10x8xf32> to vector<1x10x8xf32>
    %149 = vector.shape_cast %113 : vector<10x8xf32> to vector<1x10x8xf32>
    %150 = vector.shape_cast %127 : vector<10x8xf32> to vector<1x10x8xf32>
    %151 = vector.shape_cast %141 : vector<10x8xf32> to vector<1x10x8xf32>
    %152 = tpu.concatenate %142, %143, %144, %145, %146, %147, %148, %149, %150, %151 in 0 : vector<1x10x8xf32>, vector<1x10x8xf32>, vector<1x10x8xf32>, vector<1x10x8xf32>, vector<1x10x8xf32>, vector<1x10x8xf32>, vector<1x10x8xf32>, vector<1x10x8xf32>, vector<1x10x8xf32>, vector<1x10x8xf32> -> vector<10x10x8xf32>
    %153 = vector.shape_cast %1 : vector<1x8xf32> to vector<1x1x8xf32>
    %154 = vector.broadcast %153 : vector<1x1x8xf32> to vector<10x10x8xf32>
    %155 = arith.addf %152, %154 : vector<10x10x8xf32>
    %c0_111 = arith.constant 0 : index
    %c0_112 = arith.constant 0 : index
    %c0_113 = arith.constant 0 : index
    %c0_114 = arith.constant 0 : index
    %156 = vector.load %arg4[%c0_111, %c0_112, %c0_113, %c0_114] : memref<1x10x10x8xf32, #tpu.memory_space<vmem>>, vector<1x10x10x8xf32>
    %157 = vector.shape_cast %156 : vector<1x10x10x8xf32> to vector<10x10x8xf32>
    %158 = vector.shape_cast %155 : vector<10x10x8xf32> to vector<1x10x10x8xf32>
    tpu.vector_store %arg4[%c0_111, %c0_112, %c0_113, %c0_114], %158 {strides = array<i32>} : memref<1x10x10x8xf32, #tpu.memory_space<vmem>>, vector<1x10x10x8xf32>,
    return
  }
  func.func @transform_0(%arg0: i32) -> (i32, i32, i32) {
    %c0_i32 = arith.constant 0 : i32
    %c0_i32_0 = arith.constant 0 : i32
    %c0_i32_1 = arith.constant 0 : i32
    return %arg0, %c0_i32, %c0_i32_0 : i32, i32, i32
  }
  func.func @transform_1(%arg0: i32) -> (i32, i32) {
    %c0_i32 = arith.constant 0 : i32
    %c0_i32_0 = arith.constant 0 : i32
    %c0_i32_1 = arith.constant 0 : i32
    return %c0_i32, %c0_i32_0 : i32, i32
  }
  func.func @transform_2(%arg0: i32) -> (i32, i32) {
    %c0_i32 = arith.constant 0 : i32
    %c0_i32_0 = arith.constant 0 : i32
    %c0_i32_1 = arith.constant 0 : i32
    return %c0_i32, %c0_i32_0 : i32, i32
  }
  func.func @transform_3(%arg0: i32) -> (i32, i32, i32, i32) {
    %c0_i32 = arith.constant 0 : i32
    %c0_i32_0 = arith.constant 0 : i32
    %c0_i32_1 = arith.constant 0 : i32
    %c0_i32_2 = arith.constant 0 : i32
    return %arg0, %c0_i32, %c0_i32_0, %c0_i32_1 : i32, i32, i32, i32
  }
}

module attributes {stable_mosaic.version = 11 : i64} {
  func.func @kernel(%arg0: i32, %arg1: memref<1x100x72xf32, #tpu.memory_space<vmem>>, %arg2: memref<72x16xf32, #tpu.memory_space<vmem>>, %arg3: memref<1x16xf32, #tpu.memory_space<vmem>>, %arg4: memref<1x2x2x16xf32, #tpu.memory_space<vmem>>, %arg5: memref<10x16xf32, #tpu.memory_space<vmem>>) attributes {dimension_semantics = [#tpu.dimension_semantics<parallel>], iteration_bounds = array<i64: 2>, scalar_prefetch = 0 : i64, scratch_operands = 1 : i64, tpu.core_type = #tpu.core_type<tc>, window_params = [{transform_indices = @transform_0, window_bounds = array<i64: 1, 100, 72>}, {pipeline_mode = #tpu.pipeline_mode<synchronous>, transform_indices = @transform_1, window_bounds = array<i64: 72, 16>}, {pipeline_mode = #tpu.pipeline_mode<synchronous>, transform_indices = @transform_2, window_bounds = array<i64: 1, 16>}, {transform_indices = @transform_3, window_bounds = array<i64: 1, 2, 2, 16>}]} {
    %c0 = arith.constant 0 : index
    %c0_0 = arith.constant 0 : index
    %0 = vector.load %arg2[%c0, %c0_0] : memref<72x16xf32, #tpu.memory_space<vmem>>, vector<72x16xf32>
    %c0_1 = arith.constant 0 : index
    %c0_2 = arith.constant 0 : index
    %1 = vector.load %arg3[%c0_1, %c0_2] : memref<1x16xf32, #tpu.memory_space<vmem>>, vector<1x16xf32>
    %c0_3 = arith.constant 0 : index
    %c0_4 = arith.constant 0 : index
    %c0_5 = arith.constant 0 : index
    %2 = vector.load %arg1[%c0_3, %c0_4, %c0_5] : memref<1x100x72xf32, #tpu.memory_space<vmem>>, vector<1x30x72xf32>
    %3 = vector.shape_cast %2 : vector<1x30x72xf32> to vector<30x72xf32>
    %cst = arith.constant dense<0.000000e+00> : vector<30x16xf32>
    %4 = tpu.matmul %3, %0, %cst {dimension_numbers = #tpu.dot_dimension_numbers<[1], [0], [0], [1], [0, 0, 1, 1], [], []>} : vector<30x72xf32>, vector<72x16xf32>, vector<30x16xf32> -> vector<30x16xf32>
    %5 = vector.extract_strided_slice %4 {offsets = [0, 0], sizes = [10, 16], strides = [1, 1]} : vector<30x16xf32> to vector<10x16xf32>
    %6 = vector.extract_strided_slice %4 {offsets = [10, 0], sizes = [10, 16], strides = [1, 1]} : vector<30x16xf32> to vector<10x16xf32>
    %7 = arith.maximumf %5, %6 : vector<10x16xf32>
    %8 = vector.extract_strided_slice %4 {offsets = [20, 0], sizes = [10, 16], strides = [1, 1]} : vector<30x16xf32> to vector<10x16xf32>
    %9 = arith.maximumf %7, %8 : vector<10x16xf32>
    %c0_6 = arith.constant 0 : index
    %c0_7 = arith.constant 0 : index
    %10 = vector.load %arg5[%c0_6, %c0_7] : memref<10x16xf32, #tpu.memory_space<vmem>>, vector<10x16xf32>
    tpu.vector_store %arg5[%c0_6, %c0_7], %9 {strides = array<i32>} : memref<10x16xf32, #tpu.memory_space<vmem>>, vector<10x16xf32>,
    %c0_8 = arith.constant 0 : index
    %c0_9 = arith.constant 0 : index
    %11 = tpu.strided_load %arg5[%c0_8, %c0_9] {strides = array<i32: 3, 1>} : memref<10x16xf32, #tpu.memory_space<vmem>>, vector<2x16xf32>
    %c1 = arith.constant 1 : index
    %c0_10 = arith.constant 0 : index
    %12 = tpu.strided_load %arg5[%c1, %c0_10] {strides = array<i32: 3, 1>} : memref<10x16xf32, #tpu.memory_space<vmem>>, vector<2x16xf32>
    %13 = arith.maximumf %11, %12 : vector<2x16xf32>
    %c2 = arith.constant 2 : index
    %c0_11 = arith.constant 0 : index
    %14 = tpu.strided_load %arg5[%c2, %c0_11] {strides = array<i32: 3, 1>} : memref<10x16xf32, #tpu.memory_space<vmem>>, vector<2x16xf32>
    %15 = arith.maximumf %13, %14 : vector<2x16xf32>
    %c0_12 = arith.constant 0 : index
    %c30 = arith.constant 30 : index
    %c0_13 = arith.constant 0 : index
    %16 = vector.load %arg1[%c0_12, %c30, %c0_13] : memref<1x100x72xf32, #tpu.memory_space<vmem>>, vector<1x30x72xf32>
    %17 = vector.shape_cast %16 : vector<1x30x72xf32> to vector<30x72xf32>
    %cst_14 = arith.constant dense<0.000000e+00> : vector<30x16xf32>
    %18 = tpu.matmul %17, %0, %cst_14 {dimension_numbers = #tpu.dot_dimension_numbers<[1], [0], [0], [1], [0, 0, 1, 1], [], []>} : vector<30x72xf32>, vector<72x16xf32>, vector<30x16xf32> -> vector<30x16xf32>
    %19 = vector.extract_strided_slice %18 {offsets = [0, 0], sizes = [10, 16], strides = [1, 1]} : vector<30x16xf32> to vector<10x16xf32>
    %20 = vector.extract_strided_slice %18 {offsets = [10, 0], sizes = [10, 16], strides = [1, 1]} : vector<30x16xf32> to vector<10x16xf32>
    %21 = arith.maximumf %19, %20 : vector<10x16xf32>
    %22 = vector.extract_strided_slice %18 {offsets = [20, 0], sizes = [10, 16], strides = [1, 1]} : vector<30x16xf32> to vector<10x16xf32>
    %23 = arith.maximumf %21, %22 : vector<10x16xf32>
    %c0_15 = arith.constant 0 : index
    %c0_16 = arith.constant 0 : index
    %24 = vector.load %arg5[%c0_15, %c0_16] : memref<10x16xf32, #tpu.memory_space<vmem>>, vector<10x16xf32>
    tpu.vector_store %arg5[%c0_15, %c0_16], %23 {strides = array<i32>} : memref<10x16xf32, #tpu.memory_space<vmem>>, vector<10x16xf32>,
    %c0_17 = arith.constant 0 : index
    %c0_18 = arith.constant 0 : index
    %25 = tpu.strided_load %arg5[%c0_17, %c0_18] {strides = array<i32: 3, 1>} : memref<10x16xf32, #tpu.memory_space<vmem>>, vector<2x16xf32>
    %c1_19 = arith.constant 1 : index
    %c0_20 = arith.constant 0 : index
    %26 = tpu.strided_load %arg5[%c1_19, %c0_20] {strides = array<i32: 3, 1>} : memref<10x16xf32, #tpu.memory_space<vmem>>, vector<2x16xf32>
    %27 = arith.maximumf %25, %26 : vector<2x16xf32>
    %c2_21 = arith.constant 2 : index
    %c0_22 = arith.constant 0 : index
    %28 = tpu.strided_load %arg5[%c2_21, %c0_22] {strides = array<i32: 3, 1>} : memref<10x16xf32, #tpu.memory_space<vmem>>, vector<2x16xf32>
    %29 = arith.maximumf %27, %28 : vector<2x16xf32>
    %30 = vector.shape_cast %15 : vector<2x16xf32> to vector<1x2x16xf32>
    %31 = vector.shape_cast %29 : vector<2x16xf32> to vector<1x2x16xf32>
    %32 = tpu.concatenate %30, %31 in 0 : vector<1x2x16xf32>, vector<1x2x16xf32> -> vector<2x2x16xf32>
    %33 = vector.shape_cast %1 : vector<1x16xf32> to vector<1x1x16xf32>
    %34 = vector.broadcast %33 : vector<1x1x16xf32> to vector<2x2x16xf32>
    %35 = arith.addf %32, %34 : vector<2x2x16xf32>
    %c0_23 = arith.constant 0 : index
    %c0_24 = arith.constant 0 : index
    %c0_25 = arith.constant 0 : index
    %c0_26 = arith.constant 0 : index
    %36 = vector.load %arg4[%c0_23, %c0_24, %c0_25, %c0_26] : memref<1x2x2x16xf32, #tpu.memory_space<vmem>>, vector<1x2x2x16xf32>
    %37 = vector.shape_cast %36 : vector<1x2x2x16xf32> to vector<2x2x16xf32>
    %38 = vector.shape_cast %35 : vector<2x2x16xf32> to vector<1x2x2x16xf32>
    tpu.vector_store %arg4[%c0_23, %c0_24, %c0_25, %c0_26], %38 {strides = array<i32>} : memref<1x2x2x16xf32, #tpu.memory_space<vmem>>, vector<1x2x2x16xf32>,
    return
  }
  func.func @transform_0(%arg0: i32) -> (i32, i32, i32) {
    %c0_i32 = arith.constant 0 : i32
    %c0_i32_0 = arith.constant 0 : i32
    %c0_i32_1 = arith.constant 0 : i32
    return %arg0, %c0_i32, %c0_i32_0 : i32, i32, i32
  }
  func.func @transform_1(%arg0: i32) -> (i32, i32) {
    %c0_i32 = arith.constant 0 : i32
    %c0_i32_0 = arith.constant 0 : i32
    %c0_i32_1 = arith.constant 0 : i32
    return %c0_i32, %c0_i32_0 : i32, i32
  }
  func.func @transform_2(%arg0: i32) -> (i32, i32) {
    %c0_i32 = arith.constant 0 : i32
    %c0_i32_0 = arith.constant 0 : i32
    %c0_i32_1 = arith.constant 0 : i32
    return %c0_i32, %c0_i32_0 : i32, i32
  }
  func.func @transform_3(%arg0: i32) -> (i32, i32, i32, i32) {
    %c0_i32 = arith.constant 0 : i32
    %c0_i32_0 = arith.constant 0 : i32
    %c0_i32_1 = arith.constant 0 : i32
    %c0_i32_2 = arith.constant 0 : i32
    return %arg0, %c0_i32, %c0_i32_0, %c0_i32_1 : i32, i32, i32, i32
  }
}

</mosaic_0001>

<bundles_post_ra>
// kernel: conv_maxpool_forward.2
= control target key start
LH: loop header
LB: loop body
LE: loop exit
PB: predicated region body
PF: predicated region fallthrough
CT: control target
= control target key end

     0   :  { %s2869_s12 = smov 0   ;;  %s3456_s0 = inlined_call_operand.vmem [shape: f32[2,1024,36], index: 0, kind: input, shape index: {}]   ;;  %s3457_s1 = inlined_call_operand.vmem [shape: f32[36,8], index: 1, kind: input, shape index: {}]   ;;  %s3458_s2 = inlined_call_operand.vmem [shape: f32[1,8], index: 2, kind: input, shape index: {}]   ;;  %s3459_s3 = inlined_call_operand.vmem [shape: f32[2,10,10,8], index: 3, kind: output, shape index: {}]  }
   0x1 LB: > { %s2240_s13 = sadd.s32 4294967295, %s2847_s12   ;;  %p2244_p0 = scmp.ge.s32.totalorder %s2847_s12, 1  ;;  %s2847_s12 = sphi %s2869_s12, %s13_s12  }
   0x2   : > { %p137_p1 = scmp.lt.s32.totalorder %s2847_s12, 3 }
   0x4   : > { %p138_p2 = pnand %p2244_p0, %p137_p1 }
   0x5   : > { %p161_p3 = scmp.lt.s32.totalorder (!%p138_p2), %s2240_s13, 1 }
   0x6   : > { %141 = sbr.rel (%p138_p2) target bundleno = 361 (0x169), region = 32 }
   0xb   : > { %v2880_v0 = vld [vmem:[%s3457_s1 + $0x20] sm:$0xf]  ;;  %vm226_vm0 = vcmask 1043456   ;;  %v2885_v1 = vld [vmem:[%s3457_s1 + $0x18] sm:$0xff]  ;;  %v2898_v2 = vld [vmem:[%s3457_s1 + $0x10] sm:$0xff]  ;;  %s3461_s13 = smov (!%p161_p3, %s2240_s13), 1 }
   0xc   : > { %2552 = vmatprep.subr.msk.mxu0 %vm226_vm0, %v2880_v0  ;;  %2580 = vmatprep.subr.msk.mxu1 %vm226_vm0, %v2880_v0  ;;  %v2909_v3 = vld [vmem:[%s3457_s1 + $0x8] sm:$0xff]  ;;  %s2381_s22 = sshll.u32 %s3461_s13, 10  ;;  %v2924_v4 = vld [vmem:[%s3457_s1] sm:$0xff]  ;;  %vm189_vm1 = vcmask 293888   ;;  %vm363_vm2 = vcmask 64512   ;;  %s2832_s28 = smul.u32 160, %s3461_s13 }
   0xd   : > { %2553 = vmatpush3.msk.msra.mxu0 %vm226_vm0, %v2880_v0  ;;  %2581 = vmatpush3.msk.msra.mxu1 %vm226_vm0, %v2880_v0  ;;  %s2917_s25 = scalar_lea.vmem %s3456_s0, %s2381_s22  ;;  %vm2165_vm3 = vcmask 58368  }
   0xe   : > { %2554 = vmatprep.subr.mxu0 %v2885_v1  ;;  %2582 = vmatprep.subr.mxu1 %v2885_v1  ;;  %v177_v5 = vld [vmem:[%s2917_s25] sm:$0xff]  ;;  %v178_v7 = vld [vmem:[%s2917_s25 + $0x8] sm:$0xff]  ;;  %v179_v9 = vld [vmem:[%s2917_s25 + $0x10] sm:$0xff]  ;;  %s3303_s6 = scalar_lea.vmem %s3459_s3, %s2832_s28 }
   0xf   : > { %2555 = vmatpush3.msra.mxu0 %v2885_v1  ;;  %2583 = vmatpush3.msra.mxu1 %v2885_v1  ;;  %v383_v6 = vld [vmem:[%s2917_s25 + $0x60] sm:$0xff]  ;;  %v384_v8 = vld [vmem:[%s2917_s25 + $0x68] sm:$0xff]  ;;  %v385_v10 = vld [vmem:[%s2917_s25 + $0x70] sm:$0xff] }
  0x10   : > { %2556 = vmatprep.subr.mxu0 %v2898_v2  ;;  %2584 = vmatprep.subr.mxu1 %v2898_v2  ;;  %v180_v11 = vld [vmem:[%s2917_s25 + $0x18] sm:$0xff]  ;;  %v181_v13 = vld [vmem:[%s2917_s25 + $0x20] sm:$0xff]  ;;  %v182_v15 = vld [vmem:[%s2917_s25 + $0x28] sm:$0xff] }
  0x11   : > { %2557 = vmatpush3.msra.mxu0 %v2898_v2  ;;  %2585 = vmatpush3.msra.mxu1 %v2898_v2  ;;  %v386_v12 = vld [vmem:[%s2917_s25 + $0x78] sm:$0xff]  ;;  %v387_v14 = vld [vmem:[%s2917_s25 + $0x80] sm:$0xff]  ;;  %v388_v16 = vld [vmem:[%s2917_s25 + $0x88] sm:$0xff] }
  0x12   : > { %2558 = vmatprep.subr.mxu0 %v2909_v3  ;;  %2586 = vmatprep.subr.mxu1 %v2909_v3  ;;  %v183_v17 = vld [vmem:[%s2917_s25 + $0x30] sm:$0xff]  ;;  %v184_v19 = vld [vmem:[%s2917_s25 + $0x38] sm:$0xff]  ;;  %v185_v21 = vld [vmem:[%s2917_s25 + $0x40] sm:$0xff] }
  0x13   : > { %2559 = vmatpush3.msra.mxu0 %v2909_v3  ;;  %2587 = vmatpush3.msra.mxu1 %v2909_v3  ;;  %v389_v18 = vld [vmem:[%s2917_s25 + $0x90] sm:$0xff]  ;;  %v390_v20 = vld [vmem:[%s2917_s25 + $0x98] sm:$0xff]  ;;  %v391_v22 = vld [vmem:[%s2917_s25 + $0xa0] sm:$0xff] }
  0x14   : > { %2560 = vmatprep.subr.mxu0 %v2924_v4  ;;  %2588 = vmatprep.subr.mxu1 %v2924_v4  ;;  %v186_v23 = vld [vmem:[%s2917_s25 + $0x48] sm:$0xff]  ;;  %v187_v25 = vld [vmem:[%s2917_s25 + $0x50] sm:$0xff]  ;;  %v188_v27 = vld [vmem:[%s2917_s25 + $0x58] sm:$0xff] }
  0x15   : > { %2561 = vmatpush3.msra.mxu0 %v2924_v4  ;;  %2562 = vmatprep.mubr.msk.f32.mxu0 %vm189_vm1, %v177_v5  ;;  %v392_v24 = vld [vmem:[%s2917_s25 + $0xa8] sm:$0xff]  ;;  %v393_v26 = vld [vmem:[%s2917_s25 + $0xb0] sm:$0xff]  ;;  %v394_v28 = vld [vmem:[%s2917_s25 + $0xb8] sm:$0xff] }
  0x16   : > { %2589 = vmatpush3.msra.mxu1 %v2924_v4  ;;  %2590 = vmatprep.mubr.msk.f32.mxu1 %vm189_vm1, %v383_v6  ;;  %v578_v29 = vld [vmem:[%s2917_s25 + $0xc0] sm:$0xff]  ;;  %v579_v31 = vld [vmem:[%s2917_s25 + $0xc8] sm:$0xff]  ;;  %v580_v33 = vld [vmem:[%s2917_s25 + $0xd0] sm:$0xff] }
  0x17   : > { %2563 = vmatmul.mubr.msk.f32.vlgmr.msra.gmra.mxu0 %vm189_vm1, %v178_v7  ;;  %2591 = vmatmul.mubr.msk.f32.vlgmr.msra.gmra.mxu1 %vm189_vm1, %v384_v8  ;;  %v773_v30 = vld [vmem:[%s2917_s25 + $0x120] sm:$0xff]  ;;  %v774_v32 = vld [vmem:[%s2917_s25 + $0x128] sm:$0xff]  ;;  %v775_v34 = vld [vmem:[%s2917_s25 + $0x130] sm:$0xff] }
  0x18   : > { %2608 = vmatprep.subr.msk.mxu0 %vm226_vm0, %v2880_v0  ;;  %2565 = vmatprep.mubr.msk.f32.mxu0 %vm189_vm1, %v179_v9  ;;  %v581_v35 = vld [vmem:[%s2917_s25 + $0xd8] sm:$0xff]  ;;  %v582_v37 = vld [vmem:[%s2917_s25 + $0xe0] sm:$0xff]  ;;  %v583_v39 = vld [vmem:[%s2917_s25 + $0xe8] sm:$0xff] }
  0x19   : > { %2609 = vmatpush3.msk.msra.mxu0 %vm226_vm0, %v2880_v0  ;;  %2593 = vmatprep.mubr.msk.f32.mxu1 %vm189_vm1, %v385_v10  ;;  %v776_v36 = vld [vmem:[%s2917_s25 + $0x138] sm:$0xff]  ;;  %v777_v38 = vld [vmem:[%s2917_s25 + $0x140] sm:$0xff]  ;;  %v778_v40 = vld [vmem:[%s2917_s25 + $0x148] sm:$0xff] }
  0x1a   : > { %2610 = vmatprep.subr.mxu0 %v2885_v1  ;;  %2636 = vmatprep.subr.msk.mxu1 %vm226_vm0, %v2880_v0  ;;  %v584_v41 = vld [vmem:[%s2917_s25 + $0xf0] sm:$0xff]  ;;  %v585_v43 = vld [vmem:[%s2917_s25 + $0xf8] sm:$0xff]  ;;  %v586_v45 = vld [vmem:[%s2917_s25 + $0x100] sm:$0xff] }
  0x1b   : > { %2566 = vmatmul.mubr.msk.f32.gmra.mxu0 %vm189_vm1, %v180_v11  ;;  %2594 = vmatmul.mubr.msk.f32.gmra.mxu1 %vm189_vm1, %v386_v12  ;;  %v779_v42 = vld [vmem:[%s2917_s25 + $0x150] sm:$0xff]  ;;  %v780_v44 = vld [vmem:[%s2917_s25 + $0x158] sm:$0xff]  ;;  %v781_v46 = vld [vmem:[%s2917_s25 + $0x160] sm:$0xff] }
  0x1c   : > { %2611 = vmatpush3.msra.mxu0 %v2885_v1  ;;  %2568 = vmatprep.mubr.msk.f32.mxu0 %vm189_vm1, %v181_v13  ;;  %v587_v47 = vld [vmem:[%s2917_s25 + $0x108] sm:$0xff]  ;;  %v588_v49 = vld [vmem:[%s2917_s25 + $0x110] sm:$0xff]  ;;  %v589_v51 = vld [vmem:[%s2917_s25 + $0x118] sm:$0xff] }
  0x1d   : > { %2596 = vmatprep.mubr.msk.f32.mxu1 %vm189_vm1, %v387_v14  ;;  %2637 = vmatpush3.msk.msra.mxu1 %vm226_vm0, %v2880_v0  ;;  %v782_v48 = vld [vmem:[%s2917_s25 + $0x168] sm:$0xff]  ;;  %v783_v50 = vld [vmem:[%s2917_s25 + $0x170] sm:$0xff]  ;;  %v784_v52 = vld [vmem:[%s2917_s25 + $0x178] sm:$0xff] }
  0x1e   : > { %2612 = vmatprep.subr.mxu0 %v2898_v2  ;;  %2638 = vmatprep.subr.mxu1 %v2885_v1  ;;  %v968_v53 = vld [vmem:[%s2917_s25 + $0x180] sm:$0xff]  ;;  %v969_v55 = vld [vmem:[%s2917_s25 + $0x188] sm:$0xff]  ;;  %v970_v57 = vld [vmem:[%s2917_s25 + $0x190] sm:$0xff] }
  0x1f   : > { %2569 = vmatmul.mubr.msk.f32.gmra.mxu0 %vm189_vm1, %v182_v15  ;;  %2597 = vmatmul.mubr.msk.f32.gmra.mxu1 %vm189_vm1, %v388_v16  ;;  %v1163_v54 = vld [vmem:[%s2917_s25 + $0x1e0] sm:$0xff]  ;;  %v1164_v56 = vld [vmem:[%s2917_s25 + $0x1e8] sm:$0xff]  ;;  %v1165_v58 = vld [vmem:[%s2917_s25 + $0x1f0] sm:$0xff] }
  0x20   : > { %2571 = vmatprep.mubr.msk.f32.mxu0 %vm189_vm1, %v183_v17  ;;  %2599 = vmatprep.mubr.msk.f32.mxu1 %vm189_vm1, %v389_v18  ;;  %v971_v59 = vld [vmem:[%s2917_s25 + $0x198] sm:$0xff]  ;;  %v972_v61 = vld [vmem:[%s2917_s25 + $0x1a0] sm:$0xff]  ;;  %v973_v63 = vld [vmem:[%s2917_s25 + $0x1a8] sm:$0xff] }
  0x21   : > { %2613 = vmatpush3.msra.mxu0 %v2898_v2  ;;  %2639 = vmatpush3.msra.mxu1 %v2885_v1  ;;  %v1166_v60 = vld [vmem:[%s2917_s25 + $0x1f8] sm:$0xff]  ;;  %v1167_v62 = vld [vmem:[%s2917_s25 + $0x200] sm:$0xff]  ;;  %v1168_v5 = vld [vmem:[%s2917_s25 + $0x208] sm:$0xff] }
  0x22   : > { %2614 = vmatprep.subr.mxu0 %v2909_v3  ;;  %2640 = vmatprep.subr.mxu1 %v2898_v2  ;;  %v974_v6 = vld [vmem:[%s2917_s25 + $0x1b0] sm:$0xff]  ;;  %v975_v8 = vld [vmem:[%s2917_s25 + $0x1b8] sm:$0xff]  ;;  %v976_v10 = vld [vmem:[%s2917_s25 + $0x1c0] sm:$0xff] }
  0x23   : > { %2572 = vmatmul.mubr.msk.f32.gmra.mxu0 %vm189_vm1, %v184_v19  ;;  %2600 = vmatmul.mubr.msk.f32.gmra.mxu1 %vm189_vm1, %v390_v20  ;;  %v1169_v7 = vld [vmem:[%s2917_s25 + $0x210] sm:$0xff]  ;;  %v1170_v9 = vld [vmem:[%s2917_s25 + $0x218] sm:$0xff]  ;;  %v1171_v11 = vld [vmem:[%s2917_s25 + $0x220] sm:$0xff] }
  0x24   : > { %2574 = vmatprep.mubr.msk.f32.mxu0 %vm189_vm1, %v185_v21  ;;  %2602 = vmatprep.mubr.msk.f32.mxu1 %vm189_vm1, %v391_v22  ;;  %v977_v12 = vld [vmem:[%s2917_s25 + $0x1c8] sm:$0xff]  ;;  %v978_v14 = vld [vmem:[%s2917_s25 + $0x1d0] sm:$0xff]  ;;  %v979_v16 = vld [vmem:[%s2917_s25 + $0x1d8] sm:$0xff] }
  0x25   : > { %2615 = vmatpush3.msra.mxu0 %v2909_v3  ;;  %2641 = vmatpush3.msra.mxu1 %v2898_v2  ;;  %v1172_v13 = vld [vmem:[%s2917_s25 + $0x228] sm:$0xff]  ;;  %v1173_v15 = vld [vmem:[%s2917_s25 + $0x230] sm:$0xff]  ;;  %v1174_v17 = vld [vmem:[%s2917_s25 + $0x238] sm:$0xff] }
  0x26   : > { %2616 = vmatprep.subr.mxu0 %v2924_v4  ;;  %2642 = vmatprep.subr.mxu1 %v2909_v3  ;;  %v1358_v18 = vld [vmem:[%s2917_s25 + $0x240] sm:$0xff]  ;;  %v1359_v20 = vld [vmem:[%s2917_s25 + $0x248] sm:$0xff]  ;;  %v1360_v22 = vld [vmem:[%s2917_s25 + $0x250] sm:$0xff] }
  0x27   : > { %2575 = vmatmul.mubr.msk.f32.gmra.mxu0 %vm189_vm1, %v186_v23  ;;  %2603 = vmatmul.mubr.msk.f32.gmra.mxu1 %vm189_vm1, %v392_v24  ;;  %v1553_v19 = vld [vmem:[%s2917_s25 + $0x2a0] sm:$0xff]  ;;  %v1554_v21 = vld [vmem:[%s2917_s25 + $0x2a8] sm:$0xff]  ;;  %v1555_v23 = vld [vmem:[%s2917_s25 + $0x2b0] sm:$0xff] }
  0x28   : > { %2577 = vmatprep.mubr.msk.f32.mxu0 %vm189_vm1, %v187_v25  ;;  %2605 = vmatprep.mubr.msk.f32.mxu1 %vm189_vm1, %v393_v26  ;;  %v1361_v24 = vld [vmem:[%s2917_s25 + $0x258] sm:$0xff]  ;;  %v1362_v26 = vld [vmem:[%s2917_s25 + $0x260] sm:$0xff] }
  0x29   : > { %2617 = vmatpush3.msra.mxu0 %v2924_v4  ;;  %2643 = vmatpush3.msra.mxu1 %v2909_v3  ;;  %v1556_v25 = vld [vmem:[%s2917_s25 + $0x2b8] sm:$0xff] }
  0x2a   : > { %2644 = vmatprep.subr.mxu1 %v2924_v4  ;;  %2664 = vmatprep.subr.msk.mxu0 %vm226_vm0, %v2880_v0 }
  0x2b   : > { %2578 = vmatmul.mubr.msk.f32.gmra.mxu0 %vm189_vm1, %v188_v27  ;;  %2606 = vmatmul.mubr.msk.f32.gmra.mxu1 %vm189_vm1, %v394_v28  ;;  %v1557_v27 = vld [vmem:[%s2917_s25 + $0x2c0] sm:$0xff]  ;;  %v1363_v28 = vld [vmem:[%s2917_s25 + $0x268] sm:$0xff] }
  0x2c   : > { %2618 = vmatprep.mubr.msk.f32.mxu0 %vm189_vm1, %v578_v29  ;;  %2645 = vmatpush3.msra.mxu1 %v2924_v4  ;;  %v1558_v29 = vld [vmem:[%s2917_s25 + $0x2c8] sm:$0xff] }
  0x2d   : > { %2646 = vmatprep.mubr.msk.f32.mxu1 %vm189_vm1, %v773_v30  ;;  %2692 = vmatprep.subr.msk.mxu1 %vm226_vm0, %v2880_v0  ;;  %v1364_v30 = vld [vmem:[%s2917_s25 + $0x270] sm:$0xff] }
  0x2f   : > { %2619 = vmatmul.mubr.msk.f32.vlgmr.msra.gmra.mxu0 %vm189_vm1, %v579_v31  ;;  %2647 = vmatmul.mubr.msk.f32.vlgmr.msra.gmra.mxu1 %vm189_vm1, %v774_v32  ;;  %v1559_v31 = vld [vmem:[%s2917_s25 + $0x2d0] sm:$0xff]  ;;  %v1560_v32 = vld [vmem:[%s2917_s25 + $0x2d8] sm:$0xff] }
  0x30   : > { %2665 = vmatpush3.msk.msra.mxu0 %vm226_vm0, %v2880_v0  ;;  %2621 = vmatprep.mubr.msk.f32.mxu0 %vm189_vm1, %v580_v33  ;;  %v1366_v33 = vld [vmem:[%s2917_s25 + $0x280] sm:$0xff] }
  0x31   : > { %2649 = vmatprep.mubr.msk.f32.mxu1 %vm189_vm1, %v775_v34  ;;  %2666 = vmatprep.subr.mxu0 %v2885_v1  ;;  %v1561_v34 = vld [vmem:[%s2917_s25 + $0x2e0] sm:$0xff] }
  0x32   : > { %2667 = vmatpush3.msra.mxu0 %v2885_v1  ;;  %2693 = vmatpush3.msk.msra.mxu1 %vm226_vm0, %v2880_v0 }
  0x33   : > { %2622 = vmatmul.mubr.msk.f32.gmra.mxu0 %vm189_vm1, %v581_v35  ;;  %2650 = vmatmul.mubr.msk.f32.gmra.mxu1 %vm189_vm1, %v776_v36  ;;  %v1562_v35 = vld [vmem:[%s2917_s25 + $0x2e8] sm:$0xff]  ;;  %v1368_v36 = vld [vmem:[%s2917_s25 + $0x290] sm:$0xff] }
  0x34   : > { %2624 = vmatprep.mubr.msk.f32.mxu0 %vm189_vm1, %v582_v37  ;;  %2652 = vmatprep.mubr.msk.f32.mxu1 %vm189_vm1, %v777_v38  ;;  %v1563_v37 = vld [vmem:[%s2917_s25 + $0x2f0] sm:$0xff]  ;;  %v1564_v38 = vld [vmem:[%s2917_s25 + $0x2f8] sm:$0xff] }
  0x35   : > { %2668 = vmatprep.subr.mxu0 %v2898_v2  ;;  %2694 = vmatprep.subr.mxu1 %v2885_v1 }
  0x36   : > { %2669 = vmatpush3.msra.mxu0 %v2898_v2  ;;  %2695 = vmatpush3.msra.mxu1 %v2885_v1 }
  0x37   : > { %2625 = vmatmul.mubr.msk.f32.gmra.mxu0 %vm189_vm1, %v583_v39  ;;  %2653 = vmatmul.mubr.msk.f32.gmra.mxu1 %vm189_vm1, %v778_v40  ;;  %v1748_v39 = vld [vmem:[%s2917_s25 + $0x300] sm:$0xff] }
  0x38   : > { %2627 = vmatprep.mubr.msk.f32.mxu0 %vm189_vm1, %v584_v41  ;;  %2655 = vmatprep.mubr.msk.f32.mxu1 %vm189_vm1, %v779_v42  ;;  %v1943_v40 = vld [vmem:[%s2917_s25 + $0x360] sm:$0xff]  ;;  %v1944_v41 = vld [vmem:[%s2917_s25 + $0x368] sm:$0xff]  ;;  %v1750_v42 = vld [vmem:[%s2917_s25 + $0x310] sm:$0xff] }
  0x39   : > { %2670 = vmatprep.subr.mxu0 %v2909_v3  ;;  %2696 = vmatprep.subr.mxu1 %v2898_v2 }
  0x3a   : > { %2671 = vmatpush3.msra.mxu0 %v2909_v3  ;;  %2697 = vmatpush3.msra.mxu1 %v2898_v2 }
  0x3b   : > { %2628 = vmatmul.mubr.msk.f32.gmra.mxu0 %vm189_vm1, %v585_v43  ;;  %2656 = vmatmul.mubr.msk.f32.gmra.mxu1 %vm189_vm1, %v780_v44  ;;  %v1945_v43 = vld [vmem:[%s2917_s25 + $0x370] sm:$0xff]  ;;  %v1946_v44 = vld [vmem:[%s2917_s25 + $0x378] sm:$0xff] }
  0x3c   : > { %2630 = vmatprep.mubr.msk.f32.mxu0 %vm189_vm1, %v586_v45  ;;  %2658 = vmatprep.mubr.msk.f32.mxu1 %vm189_vm1, %v781_v46  ;;  %v1752_v45 = vld [vmem:[%s2917_s25 + $0x320] sm:$0xff] }
  0x3d   : > { %2672 = vmatprep.subr.mxu0 %v2924_v4  ;;  %2698 = vmatprep.subr.mxu1 %v2909_v3  ;;  %v1947_v46 = vld [vmem:[%s2917_s25 + $0x380] sm:$0xff] }
  0x3e   : > { %2673 = vmatpush3.msra.mxu0 %v2924_v4  ;;  %2699 = vmatpush3.msra.mxu1 %v2909_v3 }
  0x3f   : > { %2631 = vmatmul.mubr.msk.f32.gmra.mxu0 %vm189_vm1, %v587_v47  ;;  %2659 = vmatmul.mubr.msk.f32.gmra.mxu1 %vm189_vm1, %v782_v48  ;;  %v1753_v47 = vld [vmem:[%s2917_s25 + $0x328] sm:$0xff] }
  0x40   : > { %2633 = vmatprep.mubr.msk.f32.mxu0 %vm189_vm1, %v588_v49  ;;  %2661 = vmatprep.mubr.msk.f32.mxu1 %vm189_vm1, %v783_v50  ;;  %v1948_v48 = vld [vmem:[%s2917_s25 + $0x388] sm:$0xff]  ;;  %v1754_v49 = vld [vmem:[%s2917_s25 + $0x330] sm:$0xff] }
  0x41   : > { %2700 = vmatprep.subr.mxu1 %v2924_v4  ;;  %2720 = vmatprep.subr.msk.mxu0 %vm226_vm0, %v2880_v0  ;;  %v1949_v50 = vld [vmem:[%s2917_s25 + $0x390] sm:$0xff] }
  0x42   : > { %2701 = vmatpush3.msra.mxu1 %v2924_v4 }
  0x43   : > { %2634 = vmatmul.mubr.msk.f32.gmra.mxu0 %vm189_vm1, %v589_v51  ;;  %2662 = vmatmul.mubr.msk.f32.gmra.mxu1 %vm189_vm1, %v784_v52  ;;  %v1755_v51 = vld [vmem:[%s2917_s25 + $0x338] sm:$0xff] }
  0x44   : > { %2674 = vmatprep.mubr.msk.f32.mxu0 %vm189_vm1, %v968_v53  ;;  %2702 = vmatprep.mubr.msk.f32.mxu1 %vm189_vm1, %v1163_v54  ;;  %v1950_v52 = vld [vmem:[%s2917_s25 + $0x398] sm:$0xff]  ;;  %v1756_v53 = vld [vmem:[%s2917_s25 + $0x340] sm:$0xff] }
  0x45   : > { %2748 = vmatprep.subr.msk.mxu1 %vm226_vm0, %v2880_v0  ;;  %v1951_v54 = vld [vmem:[%s2917_s25 + $0x3a0] sm:$0xff] }
  0x47   : > { %2675 = vmatmul.mubr.msk.f32.vlgmr.msra.gmra.mxu0 %vm189_vm1, %v969_v55  ;;  %2703 = vmatmul.mubr.msk.f32.vlgmr.msra.gmra.mxu1 %vm189_vm1, %v1164_v56  ;;  %v1757_v55 = vld [vmem:[%s2917_s25 + $0x348] sm:$0xff] }
  0x48   : > { %2721 = vmatpush3.msk.msra.mxu0 %vm226_vm0, %v2880_v0  ;;  %2677 = vmatprep.mubr.msk.f32.mxu0 %vm189_vm1, %v970_v57  ;;  %v1952_v56 = vld [vmem:[%s2917_s25 + $0x3a8] sm:$0xff]  ;;  %v1758_v57 = vld [vmem:[%s2917_s25 + $0x350] sm:$0xff] }
  0x49   : > { %2705 = vmatprep.mubr.msk.f32.mxu1 %vm189_vm1, %v1165_v58  ;;  %2722 = vmatprep.subr.mxu0 %v2885_v1  ;;  %v1953_v58 = vld [vmem:[%s2917_s25 + $0x3b0] sm:$0xff] }
  0x4a   : > { %2723 = vmatpush3.msra.mxu0 %v2885_v1  ;;  %2749 = vmatpush3.msk.msra.mxu1 %vm226_vm0, %v2880_v0 }
  0x4b   : > { %2678 = vmatmul.mubr.msk.f32.gmra.mxu0 %vm189_vm1, %v971_v59  ;;  %2706 = vmatmul.mubr.msk.f32.gmra.mxu1 %vm189_vm1, %v1166_v60  ;;  %v1759_v59 = vld [vmem:[%s2917_s25 + $0x358] sm:$0xff] }
  0x4c   : > { %2680 = vmatprep.mubr.msk.f32.mxu0 %vm189_vm1, %v972_v61  ;;  %2708 = vmatprep.mubr.msk.f32.mxu1 %vm189_vm1, %v1167_v62  ;;  %v1954_v60 = vld [vmem:[%s2917_s25 + $0x3b8] sm:$0xff] }
  0x4d   : > { %2724 = vmatprep.subr.mxu0 %v2898_v2  ;;  %2750 = vmatprep.subr.mxu1 %v2885_v1 }
  0x4e   : > { %2725 = vmatpush3.msra.mxu0 %v2898_v2  ;;  %2751 = vmatpush3.msra.mxu1 %v2885_v1 }
  0x4f   : > { %2681 = vmatmul.mubr.msk.f32.gmra.mxu0 %vm189_vm1, %v973_v63  ;;  %2709 = vmatmul.mubr.msk.f32.gmra.mxu1 %vm189_vm1, %v1168_v5 }
  0x50   : > { %2683 = vmatprep.mubr.msk.f32.mxu0 %vm189_vm1, %v974_v6  ;;  %2711 = vmatprep.mubr.msk.f32.mxu1 %vm189_vm1, %v1169_v7 }
  0x51   : > { %2726 = vmatprep.subr.mxu0 %v2909_v3  ;;  %2752 = vmatprep.subr.mxu1 %v2898_v2 }
  0x52   : > { %2727 = vmatpush3.msra.mxu0 %v2909_v3  ;;  %2753 = vmatpush3.msra.mxu1 %v2898_v2 }
  0x53   : > { %2684 = vmatmul.mubr.msk.f32.gmra.mxu0 %vm189_vm1, %v975_v8  ;;  %2712 = vmatmul.mubr.msk.f32.gmra.mxu1 %vm189_vm1, %v1170_v9 }
  0x54   : > { %2686 = vmatprep.mubr.msk.f32.mxu0 %vm189_vm1, %v976_v10  ;;  %2714 = vmatprep.mubr.msk.f32.mxu1 %vm189_vm1, %v1171_v11 }
  0x55   : > { %2728 = vmatprep.subr.mxu0 %v2924_v4  ;;  %2754 = vmatprep.subr.mxu1 %v2909_v3 }
  0x56   : > { %2729 = vmatpush3.msra.mxu0 %v2924_v4  ;;  %2755 = vmatpush3.msra.mxu1 %v2909_v3 }
  0x57   : > { %2687 = vmatmul.mubr.msk.f32.gmra.mxu0 %vm189_vm1, %v977_v12  ;;  %2715 = vmatmul.mubr.msk.f32.gmra.mxu1 %vm189_vm1, %v1172_v13 }
  0x58   : > { %2689 = vmatprep.mubr.msk.f32.mxu0 %vm189_vm1, %v978_v14  ;;  %2717 = vmatprep.mubr.msk.f32.mxu1 %vm189_vm1, %v1173_v15 }
  0x59   : > { %2756 = vmatprep.subr.mxu1 %v2924_v4  ;;  %2776 = vmatprep.subr.msk.mxu0 %vm226_vm0, %v2880_v0 }
  0x5a   : > { %2757 = vmatpush3.msra.mxu1 %v2924_v4 }
  0x5b   : > { %2690 = vmatmul.mubr.msk.f32.gmra.mxu0 %vm189_vm1, %v979_v16  ;;  %2718 = vmatmul.mubr.msk.f32.gmra.mxu1 %vm189_vm1, %v1174_v17 }
  0x5c   : > { %2730 = vmatprep.mubr.msk.f32.mxu0 %vm189_vm1, %v1358_v18  ;;  %2758 = vmatprep.mubr.msk.f32.mxu1 %vm189_vm1, %v1553_v19 }
  0x5d   : > { %2804 = vmatprep.subr.msk.mxu1 %vm226_vm0, %v2880_v0 }
  0x5f   : > { %2731 = vmatmul.mubr.msk.f32.vlgmr.msra.gmra.mxu0 %vm189_vm1, %v1359_v20  ;;  %2759 = vmatmul.mubr.msk.f32.vlgmr.msra.gmra.mxu1 %vm189_vm1, %v1554_v21 }
  0x60   : > { %2777 = vmatpush3.msk.msra.mxu0 %vm226_vm0, %v2880_v0  ;;  %2733 = vmatprep.mubr.msk.f32.mxu0 %vm189_vm1, %v1360_v22 }
  0x61   : > { %2761 = vmatprep.mubr.msk.f32.mxu1 %vm189_vm1, %v1555_v23  ;;  %2778 = vmatprep.subr.mxu0 %v2885_v1 }
  0x62   : > { %2779 = vmatpush3.msra.mxu0 %v2885_v1  ;;  %2805 = vmatpush3.msk.msra.mxu1 %vm226_vm0, %v2880_v0  ;;  %v1365_v0 = vld [vmem:[%s2917_s25 + $0x278] sm:$0xff] }
  0x63   : > { %2734 = vmatmul.mubr.msk.f32.gmra.mxu0 %vm189_vm1, %v1361_v24  ;;  %2762 = vmatmul.mubr.msk.f32.gmra.mxu1 %vm189_vm1, %v1556_v25 }
  0x64   : > { %2736 = vmatprep.mubr.msk.f32.mxu0 %vm189_vm1, %v1362_v26  ;;  %2764 = vmatprep.mubr.msk.f32.mxu1 %vm189_vm1, %v1557_v27 }
  0x65   : > { %2780 = vmatprep.subr.mxu0 %v2898_v2  ;;  %2806 = vmatprep.subr.mxu1 %v2885_v1 }
  0x66   : > { %2781 = vmatpush3.msra.mxu0 %v2898_v2  ;;  %2807 = vmatpush3.msra.mxu1 %v2885_v1  ;;  %v1367_v1 = vld [vmem:[%s2917_s25 + $0x288] sm:$0xff] }
  0x67   : > { %2737 = vmatmul.mubr.msk.f32.gmra.mxu0 %vm189_vm1, %v1363_v28  ;;  %2765 = vmatmul.mubr.msk.f32.gmra.mxu1 %vm189_vm1, %v1558_v29 }
  0x68   : > { %2739 = vmatprep.mubr.msk.f32.mxu0 %vm189_vm1, %v1364_v30  ;;  %2767 = vmatprep.mubr.msk.f32.mxu1 %vm189_vm1, %v1559_v31 }
  0x69   : > { %2782 = vmatprep.subr.mxu0 %v2909_v3  ;;  %2808 = vmatprep.subr.mxu1 %v2898_v2 }
  0x6a   : > { %2783 = vmatpush3.msra.mxu0 %v2909_v3  ;;  %2809 = vmatpush3.msra.mxu1 %v2898_v2  ;;  %v1369_v2 = vld [vmem:[%s2917_s25 + $0x298] sm:$0xff] }
  0x6b   : > { %2740 = vmatmul.mubr.msk.f32.gmra.mxu0 %vm189_vm1, %v1365_v0  ;;  %2768 = vmatmul.mubr.msk.f32.gmra.mxu1 %vm189_vm1, %v1560_v32 }
  0x6c   : > { %2742 = vmatprep.mubr.msk.f32.mxu0 %vm189_vm1, %v1366_v33  ;;  %2770 = vmatprep.mubr.msk.f32.mxu1 %vm189_vm1, %v1561_v34 }
  0x6d   : > { %2784 = vmatprep.subr.mxu0 %v2924_v4  ;;  %2810 = vmatprep.subr.mxu1 %v2909_v3 }
  0x6e   : > { %2785 = vmatpush3.msra.mxu0 %v2924_v4  ;;  %2811 = vmatpush3.msra.mxu1 %v2909_v3  ;;  %v1749_v3 = vld [vmem:[%s2917_s25 + $0x308] sm:$0xff] }
  0x6f   : > { %2743 = vmatmul.mubr.msk.f32.gmra.mxu0 %vm189_vm1, %v1367_v1  ;;  %2771 = vmatmul.mubr.msk.f32.gmra.mxu1 %vm189_vm1, %v1562_v35 }
  0x70   : > { %2745 = vmatprep.mubr.msk.f32.mxu0 %vm189_vm1, %v1368_v36  ;;  %2773 = vmatprep.mubr.msk.f32.mxu1 %vm189_vm1, %v1563_v37 }
  0x71   : > { %2812 = vmatprep.subr.mxu1 %v2924_v4 }
  0x72   : > { %2813 = vmatpush3.msra.mxu1 %v2924_v4  ;;  %v1751_v4 = vld [vmem:[%s2917_s25 + $0x318] sm:$0xff] }
  0x73   : > { %2746 = vmatmul.mubr.msk.f32.gmra.mxu0 %vm189_vm1, %v1369_v2  ;;  %2774 = vmatmul.mubr.msk.f32.gmra.mxu1 %vm189_vm1, %v1564_v38 }
  0x74   : > { %2786 = vmatprep.mubr.msk.f32.mxu0 %vm189_vm1, %v1748_v39  ;;  %2814 = vmatprep.mubr.msk.f32.mxu1 %vm189_vm1, %v1943_v40 }
  0x77   : > { %2787 = vmatmul.mubr.msk.f32.vlgmr.msra.gmra.mxu0 %vm189_vm1, %v1749_v3  ;;  %2815 = vmatmul.mubr.msk.f32.vlgmr.msra.gmra.mxu1 %vm189_vm1, %v1944_v41 }
  0x78   : > { %2789 = vmatprep.mubr.msk.f32.mxu0 %vm189_vm1, %v1750_v42  ;;  %2817 = vmatprep.mubr.msk.f32.mxu1 %vm189_vm1, %v1945_v43 }
  0x7b   : > { %2790 = vmatmul.mubr.msk.f32.gmra.mxu0 %vm189_vm1, %v1751_v4  ;;  %2818 = vmatmul.mubr.msk.f32.gmra.mxu1 %vm189_vm1, %v1946_v44 }
  0x7c   : > { %2792 = vmatprep.mubr.msk.f32.mxu0 %vm189_vm1, %v1752_v45  ;;  %2820 = vmatprep.mubr.msk.f32.mxu1 %vm189_vm1, %v1947_v46  ;;  %v3292_v46 = vld [vmem:[%s3458_s2] ss:$0 sm:$0xff] }
  0x7f   : > { %2793 = vmatmul.mubr.msk.f32.gmra.mxu0 %vm189_vm1, %v1753_v47  ;;  %2821 = vmatmul.mubr.msk.f32.gmra.mxu1 %vm189_vm1, %v1948_v48 }
  0x80   : > { %2795 = vmatprep.mubr.msk.f32.mxu0 %vm189_vm1, %v1754_v49  ;;  %2823 = vmatprep.mubr.msk.f32.mxu1 %vm189_vm1, %v1949_v50 }
  0x83   : > { %2796 = vmatmul.mubr.msk.f32.gmra.mxu0 %vm189_vm1, %v1755_v51  ;;  %2824 = vmatmul.mubr.msk.f32.gmra.mxu1 %vm189_vm1, %v1950_v52 }
  0x84   : > { %2798 = vmatprep.mubr.msk.f32.mxu0 %vm189_vm1, %v1756_v53  ;;  %2826 = vmatprep.mubr.msk.f32.mxu1 %vm189_vm1, %v1951_v54 }
  0x87   : > { %2799 = vmatmul.mubr.msk.f32.gmra.mxu0 %vm189_vm1, %v1757_v55  ;;  %2827 = vmatmul.mubr.msk.f32.gmra.mxu1 %vm189_vm1, %v1952_v56 }
  0x88   : > { %2801 = vmatprep.mubr.msk.f32.mxu0 %vm189_vm1, %v1758_v57  ;;  %2829 = vmatprep.mubr.msk.f32.mxu1 %vm189_vm1, %v1953_v58 }
  0x8b   : > { %2802 = vmatmul.mubr.msk.f32.gmra.mxu0 %vm189_vm1, %v1759_v59  ;;  %2830 = vmatmul.mubr.msk.f32.gmra.mxu1 %vm189_vm1, %v1954_v60 }
  0xd7   : > { %v2564_v61 = vpop.f32.mrf.mxu0  ;;  %v2592_v62 = vpop.f32.mrf.mxu1 }
  0xd9   : > { %v296_v63 = vpop.f32.mrf.mxu0  ;;  %v497_v5 = vpop.f32.mrf.mxu1 }
  0xdb   : > { %v2567_v6 = vpop.f32.mrf.mxu0  ;;  %v2595_v7 = vpop.f32.mrf.mxu1 }
  0xdd   : > { %v306_v8 = vpop.f32.mrf.mxu0  ;;  %v507_v9 = vpop.f32.mrf.mxu1 }
  0xdf   : > { %v2570_v10 = vpop.f32.mrf.mxu0  ;;  %v2598_v11 = vpop.f32.mrf.mxu1 }
  0xe0   : > { %v356_v18 = vmax.f32 %v2564_v61, %v2570_v10  ;;  %v557_v38 = vmax.f32 %v2592_v62, %v2598_v11 }
  0xe1   : > { %v316_v12 = vpop.f32.mrf.mxu0  ;;  %v517_v13 = vpop.f32.mrf.mxu1 }
  0xe2   : > { %v355_v21 = vmax.f32 %v296_v63, %v316_v12  ;;  %v556_v39 = vmax.f32 %v497_v5, %v517_v13 }
  0xe3   : > { %v2573_v14 = vpop.f32.mrf.mxu0  ;;  %v2601_v15 = vpop.f32.mrf.mxu1 }
  0xe4   : > { %v358_v25 = vmax.f32 %v2567_v6, %v2573_v14  ;;  %v559_v36 = vmax.f32 %v2595_v7, %v2601_v15 }
  0xe5   : > { %v326_v16 = vpop.f32.mrf.mxu0  ;;  %v527_v17 = vpop.f32.mrf.mxu1 }
  0xe6   : > { %v357_v29 = vmax.f32 %v306_v8, %v326_v16  ;;  %v558_v40 = vmax.f32 %v507_v9, %v527_v17 }
  0xe7   : > { %v2576_v19 = vpop.f32.mrf.mxu0  ;;  %v2604_v20 = vpop.f32.mrf.mxu1 }
  0xe8   : > { %v360_v22 = vmax.f32 %v356_v18, %v2576_v19  ;;  %v561_v44 = vmax.f32 %v557_v38, %v2604_v20 }
  0xe9   : > { %v336_v23 = vpop.f32.mrf.mxu0  ;;  %v537_v24 = vpop.f32.mrf.mxu1 }
  0xea   : > { %365 = vst.msk [vmem:[#allocation2 + $0x8] sm:$0xff] %vm363_vm2, %v360_v22  ;;  %v359_v26 = vmax.f32 %v355_v21, %v336_v23  ;;  %v560_v45 = vmax.f32 %v556_v39, %v537_v24 }
  0xeb   : > { %v2579_v27 = vpop.f32.mrf.mxu0  ;;  %v2607_v28 = vpop.f32.mrf.mxu1 }
  0xec   : > { %364 = vst.msk [vmem:[#allocation2] sm:$0xff] %vm363_vm2, %v359_v26  ;;  %v362_v30 = vmax.f32 %v358_v25, %v2579_v27  ;;  %v563_v42 = vmax.f32 %v559_v36, %v2607_v28 }
  0xed   : > { %v346_v31 = vpop.f32.mrf.mxu0  ;;  %v547_v0 = vpop.f32.mrf.mxu1 }
  0xee   : > { %367 = vst.msk [vmem:[#allocation2 + $0x18] sm:$0xff] %vm363_vm2, %v362_v30  ;;  %v361_v32 = vmax.f32 %v357_v29, %v346_v31  ;;  %v562_v49 = vmax.f32 %v558_v40, %v547_v0 }
  0xef   : > { %v2620_v33 = vpop.f32.mrf.mxu0  ;;  %v3273_v34 = vpop.f32.mrf.mxu1 }
  0xf0   : > { %366 = vst.msk [vmem:[#allocation2 + $0x10] sm:$0xff] %vm363_vm2, %v361_v32 }
  0xf1   : > { %v3276_v1 = vpop.f32.mrf.mxu0  ;;  %v3278_v35 = vpop.f32.mrf.mxu1 }
  0xf3   : > { %v3280_v37 = vpop.f32.mrf.mxu0  ;;  %v3282_v2 = vpop.f32.mrf.mxu1 }
  0xf5   : > { %v370_v3 = vld [vmem:[#allocation2 + $0x18] ss:$3 sm:$0x3]  ;;  %v374_v41 = vld [vmem:[#allocation2 + $0x19] ss:$3 sm:$0x3]  ;;  %v3285_v43 = vpop.f32.mrf.mxu0  ;;  %v3287_v4 = vpop.f32.mrf.mxu1 }
  0xf6   : > { %v376_v47 = vmax.f32 %v370_v3, %v374_v41  ;;  %v380_v48 = vld [vmem:[#allocation2 + $0x1a] ss:$3 sm:$0x3] }
  0xf7   : > { %567 = vst.msk [vmem:[#allocation2 + $0x18] sm:$0xff] %vm363_vm2, %v563_v42  ;;  %v368_v50 = vld [vmem:[#allocation2] ss:$3 sm:$0xff]  ;;  %v372_v51 = vld [vmem:[#allocation2 + $0x1] ss:$3 sm:$0xff]  ;;  %v2626_v53 = vpop.f32.mrf.mxu0  ;;  %v3295_v54 = vpop.f32.mrf.mxu1 }
  0xf8   : > { %v378_v52 = vld [vmem:[#allocation2 + $0x2] ss:$3 sm:$0xff]  ;;  %v382_v55 = vmax.f32 %v376_v47, %v380_v48  ;;  %v375_v56 = vmax.f32 %v368_v50, %v372_v51  ;;  %v752_v9 = vmax.f32 %v2620_v33, %v2626_v53  ;;  %v947_v41 = vmax.f32 %v3273_v34, %v3295_v54 }
  0xf9   : > { %564 = vst.msk [vmem:[#allocation2] sm:$0xff] %vm363_vm2, %v560_v45  ;;  %565 = vst.msk [vmem:[#allocation2 + $0x8] sm:$0xff] %vm363_vm2, %v561_v44  ;;  %v712_v57 = vpop.f32.mrf.mxu0  ;;  %v907_v58 = vpop.f32.mrf.mxu1 }
  0xfa   : > { %566 = vst.msk [vmem:[#allocation2 + $0x10] sm:$0xff] %vm363_vm2, %v562_v49  ;;  %v2145_v59 = vadd.f32 %v3292_v46, %v382_v55  ;;  %v381_v60 = vmax.f32 %v375_v56, %v378_v52  ;;  %v751_v16 = vmax.f32 %v3276_v1, %v712_v57  ;;  %v946_v42 = vmax.f32 %v3278_v35, %v907_v58 }
  0xfb   : > { %v2629_v61 = vpop.f32.mrf.mxu0  ;;  %v2657_v62 = vpop.f32.mrf.mxu1 }
  0xfc   : > { %2166 = vst.msk [vmem:[%s3303_s6 + $0x8] sm:$0x3] %vm2165_vm3, %v2145_v59  ;;  %v2144_v63 = vadd.f32 %v3292_v46, %v381_v60  ;;  %v754_v23 = vmax.f32 %v3280_v37, %v2629_v61  ;;  %v949_v39 = vmax.f32 %v3282_v2, %v2657_v62 }
  0xfd   : > { %v722_v5 = vpop.f32.mrf.mxu0  ;;  %v917_v6 = vpop.f32.mrf.mxu1 }
  0xfe   : > { %v569_v7 = vld [vmem:[#allocation2 + $0x18] ss:$3 sm:$0x3]  ;;  %v571_v8 = vld [vmem:[#allocation2 + $0x19] ss:$3 sm:$0x3]  ;;  %v753_v29 = vmax.f32 %v3285_v43, %v722_v5  ;;  %v948_v43 = vmax.f32 %v3287_v4, %v917_v6 }
  0xff   : > { %2164 = vst.msk [vmem:[%s3303_s6] sm:$0xff] %vm363_vm2, %v2144_v63  ;;  %v573_v10 = vmax.f32 %v569_v7, %v571_v8  ;;  %v2632_v12 = vpop.f32.mrf.mxu0  ;;  %v2660_v13 = vpop.f32.mrf.mxu1  ;;  %v575_v14 = vld [vmem:[#allocation2 + $0x1a] ss:$3 sm:$0x3] }
 0x100   : > { %v756_v17 = vmax.f32 %v752_v9, %v2632_v12  ;;  %v951_v50 = vmax.f32 %v947_v41, %v2660_v13 }
 0x101   : > { %v568_v11 = vld [vmem:[#allocation2] ss:$3 sm:$0xff]  ;;  %v570_v15 = vld [vmem:[#allocation2 + $0x1] ss:$3 sm:$0xff]  ;;  %v577_v18 = vmax.f32 %v573_v10, %v575_v14  ;;  %v574_v20 = vld [vmem:[#allocation2 + $0x2] ss:$3 sm:$0xff]  ;;  %v732_v21 = vpop.f32.mrf.mxu0  ;;  %v927_v22 = vpop.f32.mrf.mxu1 }
 0x102   : > { %v572_v19 = vmax.f32 %v568_v11, %v570_v15  ;;  %760 = vst.msk [vmem:[#allocation2 + $0x8] sm:$0xff] %vm363_vm2, %v756_v17  ;;  %v755_v24 = vmax.f32 %v751_v16, %v732_v21  ;;  %v950_v51 = vmax.f32 %v946_v42, %v927_v22 }
 0x103   : > { %v2147_v25 = vadd.f32 %v3292_v46, %v577_v18  ;;  %v2635_v27 = vpop.f32.mrf.mxu0  ;;  %v2663_v28 = vpop.f32.mrf.mxu1 }
 0x104   : > { %v576_v26 = vmax.f32 %v572_v19, %v574_v20  ;;  %759 = vst.msk [vmem:[#allocation2] sm:$0xff] %vm363_vm2, %v755_v24  ;;  %v758_v30 = vmax.f32 %v754_v23, %v2635_v27  ;;  %v953_v47 = vmax.f32 %v949_v39, %v2663_v28 }
 0x105   : > { %2168 = vst.msk [vmem:[%s3303_s6 + $0x18] sm:$0x3] %vm2165_vm3, %v2147_v25  ;;  %v742_v0 = vpop.f32.mrf.mxu0  ;;  %v937_v32 = vpop.f32.mrf.mxu1 }
 0x106   : > { %v2146_v31 = vadd.f32 %v3292_v46, %v576_v26  ;;  %762 = vst.msk [vmem:[#allocation2 + $0x18] sm:$0xff] %vm363_vm2, %v758_v30  ;;  %v757_v33 = vmax.f32 %v753_v29, %v742_v0  ;;  %v952_v53 = vmax.f32 %v948_v43, %v937_v32 }
 0x107   : > { %v2676_v1 = vpop.f32.mrf.mxu0  ;;  %v3323_v36 = vpop.f32.mrf.mxu1 }
 0x108   : > { %2167 = vst.msk [vmem:[%s3303_s6 + $0x10] sm:$0xff] %vm363_vm2, %v2146_v31  ;;  %761 = vst.msk [vmem:[#allocation2 + $0x10] sm:$0xff] %vm363_vm2, %v757_v33 }
 0x109   : > { %v1082_v37 = vpop.f32.mrf.mxu0  ;;  %v3326_v38 = vpop.f32.mrf.mxu1 }
 0x10b   : > { %v3329_v40 = vpop.f32.mrf.mxu0  ;;  %v3331_v3 = vpop.f32.mrf.mxu1 }
 0x10d   : > { %v764_v44 = vld [vmem:[#allocation2 + $0x18] ss:$3 sm:$0x3]  ;;  %v766_v45 = vld [vmem:[#allocation2 + $0x19] ss:$3 sm:$0x3]  ;;  %v1092_v48 = vpop.f32.mrf.mxu0  ;;  %v3337_v49 = vpop.f32.mrf.mxu1 }
 0x10e   : > { %v768_v2 = vmax.f32 %v764_v44, %v766_v45  ;;  %v770_v52 = vld [vmem:[#allocation2 + $0x1a] ss:$3 sm:$0x3] }
 0x10f   : > { %957 = vst.msk [vmem:[#allocation2 + $0x18] sm:$0xff] %vm363_vm2, %v953_v47  ;;  %v763_v55 = vld [vmem:[#allocation2] ss:$3 sm:$0xff]  ;;  %v765_v34 = vld [vmem:[#allocation2 + $0x1] ss:$3 sm:$0xff]  ;;  %v2682_v35 = vpop.f32.mrf.mxu0  ;;  %v3340_v56 = vpop.f32.mrf.mxu1 }
 0x110   : > { %v769_v54 = vld [vmem:[#allocation2 + $0x2] ss:$3 sm:$0xff]  ;;  %v772_v4 = vmax.f32 %v768_v2, %v770_v52  ;;  %v767_v57 = vmax.f32 %v763_v55, %v765_v34  ;;  %v1142_v10 = vmax.f32 %v2676_v1, %v2682_v35  ;;  %v1337_v45 = vmax.f32 %v3323_v36, %v3340_v56 }
 0x111   : > { %954 = vst.msk [vmem:[#allocation2] sm:$0xff] %vm363_vm2, %v950_v51  ;;  %955 = vst.msk [vmem:[#allocation2 + $0x8] sm:$0xff] %vm363_vm2, %v951_v50  ;;  %v1102_v58 = vpop.f32.mrf.mxu0  ;;  %v1297_v59 = vpop.f32.mrf.mxu1 }
 0x112   : > { %956 = vst.msk [vmem:[#allocation2 + $0x10] sm:$0xff] %vm363_vm2, %v952_v53  ;;  %v2149_v60 = vadd.f32 %v3292_v46, %v772_v4  ;;  %v771_v61 = vmax.f32 %v767_v57, %v769_v54  ;;  %v1141_v17 = vmax.f32 %v1082_v37, %v1102_v58  ;;  %v1336_v47 = vmax.f32 %v3326_v38, %v1297_v59 }
 0x113   : > { %v2685_v62 = vpop.f32.mrf.mxu0  ;;  %v2713_v63 = vpop.f32.mrf.mxu1 }
 0x114   : > { %2170 = vst.msk [vmem:[%s3303_s6 + $0x28] sm:$0x3] %vm2165_vm3, %v2149_v60  ;;  %v2148_v5 = vadd.f32 %v3292_v46, %v771_v61  ;;  %v1144_v24 = vmax.f32 %v3329_v40, %v2685_v62  ;;  %v1339_v42 = vmax.f32 %v3331_v3, %v2713_v63 }
 0x115   : > { %v1112_v6 = vpop.f32.mrf.mxu0  ;;  %v1307_v7 = vpop.f32.mrf.mxu1 }
 0x116   : > { %v959_v8 = vld [vmem:[#allocation2 + $0x18] ss:$3 sm:$0x3]  ;;  %v961_v9 = vld [vmem:[#allocation2 + $0x19] ss:$3 sm:$0x3]  ;;  %v1143_v30 = vmax.f32 %v1092_v48, %v1112_v6  ;;  %v1338_v48 = vmax.f32 %v3337_v49, %v1307_v7 }
 0x117   : > { %2169 = vst.msk [vmem:[%s3303_s6 + $0x20] sm:$0xff] %vm363_vm2, %v2148_v5  ;;  %v963_v11 = vmax.f32 %v959_v8, %v961_v9  ;;  %v2688_v13 = vpop.f32.mrf.mxu0  ;;  %v2716_v14 = vpop.f32.mrf.mxu1  ;;  %v965_v15 = vld [vmem:[#allocation2 + $0x1a] ss:$3 sm:$0x3] }
 0x118   : > { %v1146_v18 = vmax.f32 %v1142_v10, %v2688_v13  ;;  %v1341_v55 = vmax.f32 %v1337_v45, %v2716_v14 }
 0x119   : > { %v958_v12 = vld [vmem:[#allocation2] ss:$3 sm:$0xff]  ;;  %v960_v16 = vld [vmem:[#allocation2 + $0x1] ss:$3 sm:$0xff]  ;;  %v967_v19 = vmax.f32 %v963_v11, %v965_v15  ;;  %v964_v21 = vld [vmem:[#allocation2 + $0x2] ss:$3 sm:$0xff]  ;;  %v1122_v22 = vpop.f32.mrf.mxu0  ;;  %v1317_v23 = vpop.f32.mrf.mxu1 }
 0x11a   : > { %v962_v20 = vmax.f32 %v958_v12, %v960_v16  ;;  %1150 = vst.msk [vmem:[#allocation2 + $0x8] sm:$0xff] %vm363_vm2, %v1146_v18  ;;  %v1145_v25 = vmax.f32 %v1141_v17, %v1122_v22  ;;  %v1340_v34 = vmax.f32 %v1336_v47, %v1317_v23 }
 0x11b   : > { %v2151_v26 = vadd.f32 %v3292_v46, %v967_v19  ;;  %v2691_v28 = vpop.f32.mrf.mxu0  ;;  %v2719_v29 = vpop.f32.mrf.mxu1 }
 0x11c   : > { %v966_v27 = vmax.f32 %v962_v20, %v964_v21  ;;  %1149 = vst.msk [vmem:[#allocation2] sm:$0xff] %vm363_vm2, %v1145_v25  ;;  %v1148_v31 = vmax.f32 %v1144_v24, %v2691_v28  ;;  %v1343_v2 = vmax.f32 %v1339_v42, %v2719_v29 }
 0x11d   : > { %2172 = vst.msk [vmem:[%s3303_s6 + $0x38] sm:$0x3] %vm2165_vm3, %v2151_v26  ;;  %v1132_v32 = vpop.f32.mrf.mxu0  ;;  %v1327_v33 = vpop.f32.mrf.mxu1 }
 0x11e   : > { %v2150_v0 = vadd.f32 %v3292_v46, %v966_v27  ;;  %1152 = vst.msk [vmem:[#allocation2 + $0x18] sm:$0xff] %vm363_vm2, %v1148_v31  ;;  %v1147_v1 = vmax.f32 %v1143_v30, %v1132_v32  ;;  %v1342_v35 = vmax.f32 %v1338_v48, %v1327_v33 }
 0x11f   : > { %v2732_v37 = vpop.f32.mrf.mxu0  ;;  %v3361_v39 = vpop.f32.mrf.mxu1 }
 0x120   : > { %2171 = vst.msk [vmem:[%s3303_s6 + $0x30] sm:$0xff] %vm363_vm2, %v2150_v0  ;;  %1151 = vst.msk [vmem:[#allocation2 + $0x10] sm:$0xff] %vm363_vm2, %v1147_v1 }
 0x121   : > { %v1472_v40 = vpop.f32.mrf.mxu0  ;;  %v3364_v41 = vpop.f32.mrf.mxu1 }
 0x123   : > { %v3367_v43 = vpop.f32.mrf.mxu0  ;;  %v3369_v44 = vpop.f32.mrf.mxu1 }
 0x125   : > { %v1154_v50 = vld [vmem:[#allocation2 + $0x18] ss:$3 sm:$0x3]  ;;  %v1156_v51 = vld [vmem:[#allocation2 + $0x19] ss:$3 sm:$0x3]  ;;  %v1482_v52 = vpop.f32.mrf.mxu0  ;;  %v3375_v53 = vpop.f32.mrf.mxu1 }
 0x126   : > { %v1158_v3 = vmax.f32 %v1154_v50, %v1156_v51  ;;  %v1160_v54 = vld [vmem:[#allocation2 + $0x1a] ss:$3 sm:$0x3] }
 0x127   : > { %1347 = vst.msk [vmem:[#allocation2 + $0x18] sm:$0xff] %vm363_vm2, %v1343_v2  ;;  %v1153_v4 = vld [vmem:[#allocation2] ss:$3 sm:$0xff]  ;;  %v1155_v36 = vld [vmem:[#allocation2 + $0x1] ss:$3 sm:$0xff]  ;;  %v2738_v38 = vpop.f32.mrf.mxu0  ;;  %v3378_v57 = vpop.f32.mrf.mxu1 }
 0x128   : > { %v1159_v56 = vld [vmem:[#allocation2 + $0x2] ss:$3 sm:$0xff]  ;;  %v1162_v49 = vmax.f32 %v1158_v3, %v1160_v54  ;;  %v1157_v58 = vmax.f32 %v1153_v4, %v1155_v36  ;;  %v1532_v11 = vmax.f32 %v2732_v37, %v2738_v38  ;;  %v1727_v51 = vmax.f32 %v3361_v39, %v3378_v57 }
 0x129   : > { %1344 = vst.msk [vmem:[#allocation2] sm:$0xff] %vm363_vm2, %v1340_v34  ;;  %1345 = vst.msk [vmem:[#allocation2 + $0x8] sm:$0xff] %vm363_vm2, %v1341_v55  ;;  %v1492_v59 = vpop.f32.mrf.mxu0  ;;  %v1687_v60 = vpop.f32.mrf.mxu1 }
 0x12a   : > { %1346 = vst.msk [vmem:[#allocation2 + $0x10] sm:$0xff] %vm363_vm2, %v1342_v35  ;;  %v2153_v61 = vadd.f32 %v3292_v46, %v1162_v49  ;;  %v1161_v62 = vmax.f32 %v1157_v58, %v1159_v56  ;;  %v1531_v18 = vmax.f32 %v1472_v40, %v1492_v59  ;;  %v1726_v2 = vmax.f32 %v3364_v41, %v1687_v60 }
 0x12b   : > { %v2741_v63 = vpop.f32.mrf.mxu0  ;;  %v2769_v5 = vpop.f32.mrf.mxu1 }
 0x12c   : > { %2174 = vst.msk [vmem:[%s3303_s6 + $0x48] sm:$0x3] %vm2165_vm3, %v2153_v61  ;;  %v2152_v6 = vadd.f32 %v3292_v46, %v1161_v62  ;;  %v1534_v25 = vmax.f32 %v3367_v43, %v2741_v63  ;;  %v1729_v47 = vmax.f32 %v3369_v44, %v2769_v5 }
 0x12d   : > { %v1502_v7 = vpop.f32.mrf.mxu0  ;;  %v1697_v8 = vpop.f32.mrf.mxu1 }
 0x12e   : > { %v1349_v9 = vld [vmem:[#allocation2 + $0x18] ss:$3 sm:$0x3]  ;;  %v1351_v10 = vld [vmem:[#allocation2 + $0x19] ss:$3 sm:$0x3]  ;;  %v1533_v31 = vmax.f32 %v1482_v52, %v1502_v7  ;;  %v1728_v52 = vmax.f32 %v3375_v53, %v1697_v8 }
 0x12f   : > { %2173 = vst.msk [vmem:[%s3303_s6 + $0x40] sm:$0xff] %vm363_vm2, %v2152_v6  ;;  %v1353_v12 = vmax.f32 %v1349_v9, %v1351_v10  ;;  %v2744_v14 = vpop.f32.mrf.mxu0  ;;  %v2772_v15 = vpop.f32.mrf.mxu1  ;;  %v1355_v16 = vld [vmem:[#allocation2 + $0x1a] ss:$3 sm:$0x3] }
 0x130   : > { %v1536_v19 = vmax.f32 %v1532_v11, %v2744_v14  ;;  %v1731_v4 = vmax.f32 %v1727_v51, %v2772_v15 }
 0x131   : > { %v1348_v13 = vld [vmem:[#allocation2] ss:$3 sm:$0xff]  ;;  %v1350_v17 = vld [vmem:[#allocation2 + $0x1] ss:$3 sm:$0xff]  ;;  %v1357_v20 = vmax.f32 %v1353_v12, %v1355_v16  ;;  %v1354_v22 = vld [vmem:[#allocation2 + $0x2] ss:$3 sm:$0xff]  ;;  %v1512_v23 = vpop.f32.mrf.mxu0  ;;  %v1707_v24 = vpop.f32.mrf.mxu1 }
 0x132   : > { %v1352_v21 = vmax.f32 %v1348_v13, %v1350_v17  ;;  %1540 = vst.msk [vmem:[#allocation2 + $0x8] sm:$0xff] %vm363_vm2, %v1536_v19  ;;  %v1535_v26 = vmax.f32 %v1531_v18, %v1512_v23  ;;  %v1730_v36 = vmax.f32 %v1726_v2, %v1707_v24 }
 0x133   : > { %v2155_v27 = vadd.f32 %v3292_v46, %v1357_v20  ;;  %v2747_v29 = vpop.f32.mrf.mxu0  ;;  %v2775_v30 = vpop.f32.mrf.mxu1 }
 0x134   : > { %v1356_v28 = vmax.f32 %v1352_v21, %v1354_v22  ;;  %1539 = vst.msk [vmem:[#allocation2] sm:$0xff] %vm363_vm2, %v1535_v26  ;;  %v1538_v0 = vmax.f32 %v1534_v25, %v2747_v29  ;;  %v1733_v3 = vmax.f32 %v1729_v47, %v2775_v30 }
 0x135   : > { %2176 = vst.msk [vmem:[%s3303_s6 + $0x58] sm:$0x3] %vm2165_vm3, %v2155_v27  ;;  %v1522_v33 = vpop.f32.mrf.mxu0  ;;  %v1717_v1 = vpop.f32.mrf.mxu1 }
 0x136   : > { %v2154_v32 = vadd.f32 %v3292_v46, %v1356_v28  ;;  %1542 = vst.msk [vmem:[#allocation2 + $0x18] sm:$0xff] %vm363_vm2, %v1538_v0  ;;  %v1537_v37 = vmax.f32 %v1533_v31, %v1522_v33  ;;  %v1732_v38 = vmax.f32 %v1728_v52, %v1717_v1 }
 0x137   : > { %v2788_v40 = vpop.f32.mrf.mxu0  ;;  %v3399_v42 = vpop.f32.mrf.mxu1 }
 0x138   : > { %2175 = vst.msk [vmem:[%s3303_s6 + $0x50] sm:$0xff] %vm363_vm2, %v2154_v32  ;;  %1541 = vst.msk [vmem:[#allocation2 + $0x10] sm:$0xff] %vm363_vm2, %v1537_v37 }
 0x139   : > { %v1862_v43 = vpop.f32.mrf.mxu0  ;;  %v3402_v45 = vpop.f32.mrf.mxu1 }
 0x13b   : > { %v2791_v48 = vpop.f32.mrf.mxu0  ;;  %v3405_v50 = vpop.f32.mrf.mxu1 }
 0x13d   : > { %v1544_v55 = vld [vmem:[#allocation2 + $0x18] ss:$3 sm:$0x3]  ;;  %v1546_v34 = vld [vmem:[#allocation2 + $0x19] ss:$3 sm:$0x3]  ;;  %v1872_v54 = vpop.f32.mrf.mxu0  ;;  %v3411_v35 = vpop.f32.mrf.mxu1 }
 0x13e   : > { %v1548_v56 = vmax.f32 %v1544_v55, %v1546_v34  ;;  %v1550_v44 = vld [vmem:[#allocation2 + $0x1a] ss:$3 sm:$0x3] }
 0x13f   : > { %1737 = vst.msk [vmem:[#allocation2 + $0x18] sm:$0xff] %vm363_vm2, %v1733_v3  ;;  %v1543_v49 = vld [vmem:[#allocation2] ss:$3 sm:$0xff]  ;;  %v1545_v39 = vld [vmem:[#allocation2 + $0x1] ss:$3 sm:$0xff]  ;;  %v2794_v41 = vpop.f32.mrf.mxu0  ;;  %v2822_v58 = vpop.f32.mrf.mxu1 }
 0x140   : > { %v1549_v57 = vld [vmem:[#allocation2 + $0x2] ss:$3 sm:$0xff]  ;;  %v1552_v53 = vmax.f32 %v1548_v56, %v1550_v44  ;;  %v1547_v59 = vmax.f32 %v1543_v49, %v1545_v39  ;;  %v1922_v12 = vmax.f32 %v2788_v40, %v2794_v41  ;;  %v2117_v47 = vmax.f32 %v3399_v42, %v2822_v58 }
 0x141   : > { %1734 = vst.msk [vmem:[#allocation2] sm:$0xff] %vm363_vm2, %v1730_v36  ;;  %1735 = vst.msk [vmem:[#allocation2 + $0x8] sm:$0xff] %vm363_vm2, %v1731_v4  ;;  %v1882_v60 = vpop.f32.mrf.mxu0  ;;  %v2077_v61 = vpop.f32.mrf.mxu1 }
 0x142   : > { %1736 = vst.msk [vmem:[#allocation2 + $0x10] sm:$0xff] %vm363_vm2, %v1732_v38  ;;  %v2157_v62 = vadd.f32 %v3292_v46, %v1552_v53  ;;  %v1551_v63 = vmax.f32 %v1547_v59, %v1549_v57  ;;  %v1921_v19 = vmax.f32 %v1862_v43, %v1882_v60 }
 0x143   : > { %v2797_v5 = vpop.f32.mrf.mxu0  ;;  %v2825_v6 = vpop.f32.mrf.mxu1 }
 0x144   : > { %2178 = vst.msk [vmem:[%s3303_s6 + $0x68] sm:$0x3] %vm2165_vm3, %v2157_v62  ;;  %v2156_v7 = vadd.f32 %v3292_v46, %v1551_v63  ;;  %v1924_v25 = vmax.f32 %v2791_v48, %v2797_v5  ;;  %v2119_v40 = vmax.f32 %v3405_v50, %v2825_v6  ;;  %v2116_v48 = vmax.f32 %v3402_v45, %v2077_v61 }
 0x145   : > { %v1892_v8 = vpop.f32.mrf.mxu0  ;;  %v2087_v9 = vpop.f32.mrf.mxu1 }
 0x146   : > { %v1739_v10 = vld [vmem:[#allocation2 + $0x18] ss:$3 sm:$0x3]  ;;  %v1741_v11 = vld [vmem:[#allocation2 + $0x19] ss:$3 sm:$0x3]  ;;  %v1923_v31 = vmax.f32 %v1872_v54, %v1892_v8  ;;  %v2118_v51 = vmax.f32 %v3411_v35, %v2087_v9 }
 0x147   : > { %2177 = vst.msk [vmem:[%s3303_s6 + $0x60] sm:$0xff] %vm363_vm2, %v2156_v7  ;;  %v1743_v13 = vmax.f32 %v1739_v10, %v1741_v11  ;;  %v2800_v15 = vpop.f32.mrf.mxu0  ;;  %v2828_v16 = vpop.f32.mrf.mxu1  ;;  %v1745_v17 = vld [vmem:[#allocation2 + $0x1a] ss:$3 sm:$0x3] }
 0x148   : > { %v1926_v20 = vmax.f32 %v1922_v12, %v2800_v15  ;;  %v2121_v34 = vmax.f32 %v2117_v47, %v2828_v16 }
 0x149   : > { %v1738_v14 = vld [vmem:[#allocation2] ss:$3 sm:$0xff]  ;;  %v1740_v18 = vld [vmem:[#allocation2 + $0x1] ss:$3 sm:$0xff]  ;;  %v1747_v21 = vmax.f32 %v1743_v13, %v1745_v17  ;;  %v1744_v23 = vld [vmem:[#allocation2 + $0x2] ss:$3 sm:$0xff]  ;;  %v1902_v24 = vpop.f32.mrf.mxu0  ;;  %v2097_v29 = vpop.f32.mrf.mxu1 }
 0x14a   : > { %v1742_v22 = vmax.f32 %v1738_v14, %v1740_v18  ;;  %1930 = vst.msk [vmem:[#allocation2 + $0x8] sm:$0xff] %vm363_vm2, %v1926_v20  ;;  %v1925_v26 = vmax.f32 %v1921_v19, %v1902_v24  ;;  %v2120_v3 = vmax.f32 %v2116_v48, %v2097_v29 }
 0x14b   : > { %v2159_v27 = vadd.f32 %v3292_v46, %v1747_v21  ;;  %v2803_v30 = vpop.f32.mrf.mxu0  ;;  %v2831_v37 = vpop.f32.mrf.mxu1 }
 0x14c   : > { %v1746_v28 = vmax.f32 %v1742_v22, %v1744_v23  ;;  %1929 = vst.msk [vmem:[#allocation2] sm:$0xff] %vm363_vm2, %v1925_v26  ;;  %v1928_v0 = vmax.f32 %v1924_v25, %v2803_v30  ;;  %v2123_v55 = vmax.f32 %v2119_v40, %v2831_v37 }
 0x14d   : > { %2180 = vst.msk [vmem:[%s3303_s6 + $0x78] sm:$0x3] %vm2165_vm3, %v2159_v27  ;;  %v1912_v33 = vpop.f32.mrf.mxu0  ;;  %v2107_v43 = vpop.f32.mrf.mxu1 }
 0x14e   : > { %v2158_v32 = vadd.f32 %v3292_v46, %v1746_v28  ;;  %1932 = vst.msk [vmem:[#allocation2 + $0x18] sm:$0xff] %vm363_vm2, %v1928_v0  ;;  %v1927_v1 = vmax.f32 %v1923_v31, %v1912_v33  ;;  %v2122_v36 = vmax.f32 %v2118_v51, %v2107_v43 }
 0x150   : > { %2179 = vst.msk [vmem:[%s3303_s6 + $0x70] sm:$0xff] %vm363_vm2, %v2158_v32  ;;  %1931 = vst.msk [vmem:[#allocation2 + $0x10] sm:$0xff] %vm363_vm2, %v1927_v1 }
 0x155   : > { %v1934_v2 = vld [vmem:[#allocation2 + $0x18] ss:$3 sm:$0x3]  ;;  %v1936_v52 = vld [vmem:[#allocation2 + $0x19] ss:$3 sm:$0x3] }
 0x156   : > { %v1938_v54 = vmax.f32 %v1934_v2, %v1936_v52  ;;  %v1940_v4 = vld [vmem:[#allocation2 + $0x1a] ss:$3 sm:$0x3] }
 0x157   : > { %2127 = vst.msk [vmem:[#allocation2 + $0x18] sm:$0xff] %vm363_vm2, %v2123_v55  ;;  %v1933_v50 = vld [vmem:[#allocation2] ss:$3 sm:$0xff]  ;;  %v1935_v56 = vld [vmem:[#allocation2 + $0x1] ss:$3 sm:$0xff] }
 0x158   : > { %v1939_v44 = vld [vmem:[#allocation2 + $0x2] ss:$3 sm:$0xff]  ;;  %v1942_v42 = vmax.f32 %v1938_v54, %v1940_v4  ;;  %v1937_v38 = vmax.f32 %v1933_v50, %v1935_v56 }
 0x159   : > { %2124 = vst.msk [vmem:[#allocation2] sm:$0xff] %vm363_vm2, %v2120_v3  ;;  %2125 = vst.msk [vmem:[#allocation2 + $0x8] sm:$0xff] %vm363_vm2, %v2121_v34 }
 0x15a   : > { %2126 = vst.msk [vmem:[#allocation2 + $0x10] sm:$0xff] %vm363_vm2, %v2122_v36  ;;  %v2161_v45 = vadd.f32 %v3292_v46, %v1942_v42  ;;  %v1941_v35 = vmax.f32 %v1937_v38, %v1939_v44 }
 0x15c   : > { %2182 = vst.msk [vmem:[%s3303_s6 + $0x88] sm:$0x3] %vm2165_vm3, %v2161_v45  ;;  %v2160_v49 = vadd.f32 %v3292_v46, %v1941_v35 }
 0x15e   : > { %v2129_v39 = vld [vmem:[#allocation2 + $0x18] ss:$3 sm:$0x3]  ;;  %v2131_v57 = vld [vmem:[#allocation2 + $0x19] ss:$3 sm:$0x3] }
 0x15f   : > { %2181 = vst.msk [vmem:[%s3303_s6 + $0x80] sm:$0xff] %vm363_vm2, %v2160_v49  ;;  %v2133_v41 = vmax.f32 %v2129_v39, %v2131_v57  ;;  %v2135_v53 = vld [vmem:[#allocation2 + $0x1a] ss:$3 sm:$0x3] }
 0x161   : > { %v2128_v58 = vld [vmem:[#allocation2] ss:$3 sm:$0xff]  ;;  %v2130_v59 = vld [vmem:[#allocation2 + $0x1] ss:$3 sm:$0xff]  ;;  %v2137_v60 = vmax.f32 %v2133_v41, %v2135_v53  ;;  %v2134_v62 = vld [vmem:[#allocation2 + $0x2] ss:$3 sm:$0xff] }
 0x162   : > { %v2132_v61 = vmax.f32 %v2128_v58, %v2130_v59 }
 0x163   : > { %v2163_v63 = vadd.f32 %v3292_v46, %v2137_v60 }
 0x164   : > { %v2136_v5 = vmax.f32 %v2132_v61, %v2134_v62 }
 0x165   : > { %2184 = vst.msk [vmem:[%s3303_s6 + $0x98] sm:$0x3] %vm2165_vm3, %v2163_v63 }
 0x166   : > { %v2162_v6 = vadd.f32 %v3292_v46, %v2136_v5 }
 0x168   : > { %2183 = vst.msk [vmem:[%s3303_s6 + $0x90] sm:$0xff] %vm363_vm2, %v2162_v6 }
 0x169 PF: > { %s13_s12 = sadd.s32 1, %s2847_s12  }
 0x16a   : > { %p10_p4 = scmp.ge.s32.totalorder %s13_s12, 4  }
 0x16c   :  { %12 = sbr.rel (!%p10_p4) target bundleno = 1 (0x1), region = 67 }

// kernel: conv_maxpool_forward.3
= control target key start
LH: loop header
LB: loop body
LE: loop exit
PB: predicated region body
PF: predicated region fallthrough
CT: control target
= control target key end

     0   :  { %8 = vsyncpa [#allocation4], 0  ;;  %s888_s0 = inlined_call_operand.vmem [shape: f32[2,100,72], index: 0, kind: input, shape index: {}]   ;;  %s889_s1 = inlined_call_operand.vmem [shape: f32[72,16], index: 1, kind: input, shape index: {}]   ;;  %s890_s2 = inlined_call_operand.vmem [shape: f32[1,16], index: 2, kind: input, shape index: {}]   ;;  %s891_s3 = inlined_call_operand.hbm [shape: f32[2,2,2,16], index: 3, kind: output, shape index: {}]  }
   0x1   :  { %10 = vsyncpa [#allocation4 + $0x1], 0  ;;  %s744_s12 = smov 0   ;;  %s746_s13 = smov 0  }
   0x2   :  { %s748_s14 = smov 0   ;;  %s750_s15 = smov 0  }
   0x3 LB: > { %s765_s16 = sadd.s32 4294967295, %s719_s15   ;;  %s522_s17 = sadd.s32 4294967294, %s719_s15   ;;  %s719_s15 = sphi %s750_s15, %s897_s15   ;;  %s715_s14 = sphi %s748_s14, %s896_s14   ;;  %s711_s13 = sphi %s746_s13, %s895_s13   ;;  %s707_s12 = sphi %s744_s12, %s894_s12  }
   0x4   : > { %s769_s18 = sadd.s32 1, %s719_s15   ;;  %s91_s19 = sadd.s32 1, %s715_s14 }
   0x5   : > { %s88_s20 = ssub.s32 %s719_s15, %s769_s18  ;;  %p101_p0 = scmp.ne.s32.totalorder %s715_s14, %s711_s13 }
   0x6   : > { %p89_p1 = scmp.eq.s32.totalorder %s88_s20, 0  ;;  %p102_p2 = scmp.eq.s32.totalorder %s765_s16, 1 }
   0x7   : > { %p107_p3 = scmp.ne.s32.totalorder %s711_s13, %s707_s12  ;;  %p108_p4 = scmp.eq.s32.totalorder %s522_s17, 1 }
   0x8   : > { %s780_s21 = scalar_select %p89_p1, %s715_s14, %s91_s19  }
   0x9   : > { %p782_p5 = por %p102_p2, %p101_p0  ;;  %p786_p6 = por %p108_p4, %p107_p3 }
   0xa   : > { %p525_p7 = scmp.ge.s32.totalorder %s719_s15, 1  ;;  %p140_p8 = scmp.lt.s32.totalorder %s719_s15, 3 }
   0xc   : > { %p141_p9 = pnand %p525_p7, %p140_p8 }
   0xd   : > { %p164_p10 = scmp.lt.s32.totalorder (!%p141_p9), %s765_s16, 1  ;;  %s161_s29 = sand.u32 (!%p141_p9), 1, %s711_s13  }
   0xe   : > { %144 = sbr.rel (%p141_p9) target bundleno = 282 (0x11a), region = 32  ;;  %s526_s30 = sshll.u32 (!%p141_p9), %s161_s29, 2 }
   0xf   : > { %s163_s6 = scalar_lea.vmem (!%p141_p9), [#allocation3], %s526_s30  ;;  %s542_s7 = sshll.u32 (!%p141_p9), %s765_s16, 6 }
  0x10   : > { %s460_s8 = sshll.u32 (!%p141_p9), %s163_s6, 4  ;;  %s843_s11 = scalar_lea.hbm (!%p141_p9), %s891_s3, %s542_s7  ;;  %s845_s8 = int_to_ptr.vmem [resolvable:$true] %s460_s8 }
  0x11   : > { %s848_s17 = scalar_lea.sflag (!%p141_p9), [#allocation4], %s161_s29  ;;  %s659_s19 = scalar_lea.vmem (!%p141_p9), %s845_s8, 64 }
  0x12   : > { %p660_p11 = scmp.ne.s32.totalorder (!%p141_p9), %s845_s8, %s659_s19 }
  0x13   : > { %v177_v0 = vld [vmem:[%s889_s1 + $0x40] sm:$0xff]  ;;  %v176_v1 = vld [vmem:[%s889_s1 + $0x38] sm:$0xff]  ;;  %v175_v2 = vld [vmem:[%s889_s1 + $0x30] sm:$0xff]  ;;  %s165_s5 = scalar_select %p164_p10, %s765_s16, 1  ;;  %vm183_vm0 = vcmask 588800   ;;  %vm283_vm1 = vcmask 1045504  }
  0x14   : > { %569 = vmatprep.subr.mxu0 %v177_v0  ;;  %593 = vmatprep.subr.mxu1 %v177_v0  ;;  %v174_v3 = vld [vmem:[%s889_s1 + $0x28] sm:$0xff]  ;;  %v173_v4 = vld [vmem:[%s889_s1 + $0x20] sm:$0xff]  ;;  %v172_v5 = vld [vmem:[%s889_s1 + $0x18] sm:$0xff]  ;;  %vm292_vm2 = vcmask 1043456   ;;  %vm302_vm3 = vcmask 123904   ;;  %vm300_vm4 = vcmask 130048   ;;  %p661_p12 = pnand %p660_p11, %p782_p5 }
  0x15   : > { %570 = vmatpush3.msra.mxu0 %v177_v0  ;;  %594 = vmatpush3.msra.mxu1 %v177_v0  ;;  %s617_s10 = smul.u32 104, %s165_s5  ;;  %v171_v6 = vld [vmem:[%s889_s1 + $0x10] sm:$0xff]  ;;  %v170_v7 = vld [vmem:[%s889_s1 + $0x8] sm:$0xff]  ;;  %v169_v8 = vld [vmem:[%s889_s1] sm:$0xff]  ;;  %s721_s16 = smov [#allocation3]  }
  0x16   : > { %571 = vmatprep.subr.mxu0 %v176_v1  ;;  %595 = vmatprep.subr.mxu1 %v176_v1  ;;  %v536_v45 = vld [vmem:[%s890_s2] ss:$0 sm:$0xff]  ;;  %p662_p13 = pneg %p661_p12  ;;  %s663_s20 = sshll.u32 %s721_s16, 4  ;;  %s664_s20 = int_to_ptr.vmem [resolvable:$false] %s663_s20 }
  0x17   : > { %572 = vmatpush3.msra.mxu0 %v176_v1  ;;  %596 = vmatpush3.msra.mxu1 %v176_v1  ;;  %s168_s26 = scalar_lea.vmem %s888_s0, %s617_s10  ;;  %s665_s24 = scalar_lea.vmem %s664_s20, 128 }
  0x18   : > { %573 = vmatprep.subr.mxu0 %v175_v2  ;;  %597 = vmatprep.subr.mxu1 %v175_v2  ;;  %v179_v9 = vld [vmem:[%s168_s26] sm:$0xff]  ;;  %v180_v11 = vld [vmem:[%s168_s26 + $0x8] sm:$0xff]  ;;  %v181_v13 = vld [vmem:[%s168_s26 + $0x10] sm:$0xff]  ;;  %p666_p0 = scmp.lt.s32.totalorder %s845_s8, %s664_s20  ;;  %p667_p1 = scmp.lt.s32.totalorder %s665_s24, %s659_s19 }
  0x19   : > { %574 = vmatpush3.msra.mxu0 %v175_v2  ;;  %598 = vmatpush3.msra.mxu1 %v175_v2  ;;  %v311_v10 = vld [vmem:[%s168_s26 + $0x1e] sm:$0xff]  ;;  %v312_v12 = vld [vmem:[%s168_s26 + $0x26] sm:$0xff]  ;;  %v313_v14 = vld [vmem:[%s168_s26 + $0x2e] sm:$0xff] }
  0x1a   : > { %575 = vmatprep.subr.mxu0 %v174_v3  ;;  %599 = vmatprep.subr.mxu1 %v174_v3  ;;  %v182_v15 = vld [vmem:[%s168_s26 + $0x18] sm:$0x3f]  ;;  %p668_p2 = por %p667_p1, %p666_p0 }
  0x1b   : > { %576 = vmatpush3.msra.mxu0 %v174_v3  ;;  %600 = vmatpush3.msra.mxu1 %v174_v3  ;;  %v314_v16 = vld [vmem:[%s168_s26 + $0x36] sm:$0x3f] }
  0x1c   : > { %577 = vmatprep.subr.mxu0 %v173_v4  ;;  %601 = vmatprep.subr.mxu1 %v173_v4  ;;  %p669_p3 = pnand %p668_p2, %p662_p13 }
  0x1d   : > { %578 = vmatpush3.msra.mxu0 %v173_v4  ;;  %602 = vmatpush3.msra.mxu1 %v173_v4 }
  0x1e   : > { %579 = vmatprep.subr.mxu0 %v172_v5  ;;  %603 = vmatprep.subr.mxu1 %v172_v5 }
  0x1f   : > { %580 = vmatpush3.msra.mxu0 %v172_v5  ;;  %604 = vmatpush3.msra.mxu1 %v172_v5 }
  0x20   : > { %581 = vmatprep.subr.mxu0 %v171_v6  ;;  %605 = vmatprep.subr.mxu1 %v171_v6 }
  0x21   : > { %582 = vmatpush3.msra.mxu0 %v171_v6  ;;  %606 = vmatpush3.msra.mxu1 %v171_v6 }
  0x22   : > { %583 = vmatprep.subr.mxu0 %v170_v7  ;;  %607 = vmatprep.subr.mxu1 %v170_v7 }
  0x23   : > { %584 = vmatpush3.msra.mxu0 %v170_v7  ;;  %608 = vmatpush3.msra.mxu1 %v170_v7 }
  0x24   : > { %585 = vmatprep.subr.mxu0 %v169_v8  ;;  %609 = vmatprep.subr.mxu1 %v169_v8 }
  0x25   : > { %586 = vmatpush3.msra.mxu0 %v169_v8  ;;  %587 = vmatprep.mubr.msk.f32.mxu0 %vm183_vm0, %v179_v9 }
  0x26   : > { %610 = vmatpush3.msra.mxu1 %v169_v8  ;;  %611 = vmatprep.mubr.msk.f32.mxu1 %vm183_vm0, %v311_v10 }
  0x27   : > { %588 = vmatmul.mubr.msk.f32.vlgmr.msra.gmra.mxu0 %vm183_vm0, %v180_v11  ;;  %612 = vmatmul.mubr.msk.f32.vlgmr.msra.gmra.mxu1 %vm183_vm0, %v312_v12 }
  0x28   : > { %590 = vmatprep.mubr.msk.f32.mxu0 %vm183_vm0, %v181_v13  ;;  %614 = vmatprep.mubr.msk.f32.mxu1 %vm183_vm0, %v313_v14 }
  0x2b   : > { %591 = vmatmul.mubr.msk.f32.gmra.mxu0 %vm183_vm0, %v182_v15  ;;  %615 = vmatmul.mubr.msk.f32.gmra.mxu1 %vm183_vm0, %v314_v16 }
  0xe7   : > { %v589_v17 = vpop.f32.mrf.mxu0  ;;  %v613_v18 = vpop.f32.mrf.mxu1 }
  0xe8   : > { %v284_v25 = vrot.slane %v589_v17, 2  ;;  %v414_v32 = vrot.slane %v613_v18, 2 }
  0xe9   : > { %v262_v19 = vpop.f32.mrf.mxu0  ;;  %v393_v20 = vpop.f32.mrf.mxu1 }
  0xeb   : > { %v592_v21 = vpop.f32.mrf.mxu0  ;;  %v616_v22 = vpop.f32.mrf.mxu1 }
  0xec   : > { %v423_v29 = vrot.slane %v616_v22, 4  ;;  %v294_v30 = vrot.slane %v592_v21, 4 }
  0xed   : > { %v272_v23 = vpop.f32.mrf.mxu0  ;;  %v403_v24 = vpop.f32.mrf.mxu1 }
  0xee   : > { %v285_v26 = vrot.slane %v272_v23, 2  ;;  %v293_v27 = vrot.slane %v272_v23, 4  ;;  %v415_v28 = vrot.slane %v403_v24, 2  ;;  %v422_v37 = vrot.slane %v403_v24, 4 }
  0xf0   : > { %v286_v31 = vsel %vm283_vm1, %v284_v25, %v285_v26  ;;  %v295_v34 = vsel %vm292_vm2, %v293_v27, %v294_v30  ;;  %v416_v36 = vsel %vm283_vm1, %v414_v32, %v415_v28  ;;  %v424_v39 = vsel %vm292_vm2, %v422_v37, %v423_v29 }
  0xf1   : > { %v289_v33 = vmax.f32 %v262_v19, %v286_v31  ;;  %v419_v38 = vmax.f32 %v393_v20, %v416_v36 }
  0xf3   : > { %v298_v35 = vmax.f32 %v289_v33, %v295_v34  ;;  %v427_v40 = vmax.f32 %v419_v38, %v424_v39 }
  0xf5   : > { %301 = vst.msk [vmem:[#allocation2] sm:$0xff] %vm300_vm4, %v298_v35 }
  0xfc   : > { %v304_v41 = vld [vmem:[#allocation2] ss:$3 sm:$0x3]  ;;  %v306_v42 = vld [vmem:[#allocation2 + $0x1] ss:$3 sm:$0x3] }
  0xfd   : > { %v307_v43 = vmax.f32 %v304_v41, %v306_v42  ;;  %v309_v44 = vld [vmem:[#allocation2 + $0x2] ss:$3 sm:$0x3] }
  0xfe   : > { %429 = vst.msk [vmem:[#allocation2] sm:$0xff] %vm300_vm4, %v427_v40 }
  0xff   : > { %v310_v46 = vmax.f32 %v307_v43, %v309_v44 }
 0x101   : > { %v442_v47 = vadd.f32 %v536_v45, %v310_v46 }
 0x103   : > { %444 = vst.msk [vmem:[%s163_s6] sm:$0x3] %vm302_vm3, %v442_v47 }
 0x105   : > { %v431_v48 = vld [vmem:[#allocation2] ss:$3 sm:$0x3]  ;;  %v432_v49 = vld [vmem:[#allocation2 + $0x1] ss:$3 sm:$0x3] }
 0x106   : > { %v433_v50 = vmax.f32 %v431_v48, %v432_v49  ;;  %v434_v51 = vld [vmem:[#allocation2 + $0x2] ss:$3 sm:$0x3] }
 0x108   : > { %v435_v52 = vmax.f32 %v433_v50, %v434_v51 }
 0x10a   : > { %v443_v53 = vadd.f32 %v536_v45, %v435_v52 }
 0x10c   : > { %445 = vst.msk [vmem:[%s163_s6 + $0x2] sm:$0x3] %vm302_vm3, %v443_v53 }
 0x10d   : > { %672 = shalt.err (!%p669_p3)
}
 0x10e   : > { %s673_s25 = scalar_lea.hbm %s843_s11, 64  ;;  %s677_s28 = scalar_lea.hbm %s891_s3, 128 }
 0x10f   : > { %p674_p4 = scmp.ne.s32.totalorder %s843_s11, %s673_s25  ;;  %p678_p9 = scmp.lt.s32.totalorder %s843_s11, %s891_s3 }
 0x110   : > { %p679_p10 = scmp.lt.s32.totalorder %s677_s28, %s673_s25 }
 0x111   : > { %p675_p7 = pnand %p674_p4, %p782_p5 }
 0x112   : > { %p680_p11 = por %p679_p10, %p678_p9 }
 0x113   : > { %p676_p8 = pneg %p675_p7 }
 0x115   : > { %p681_p12 = pnand %p680_p11, %p676_p8 }
 0x117   : > { %684 = shalt.err (!%p681_p12)
}
 0x118   : > { %s722_s4 = smov 32   ;;  %s723_s5 = smov 2  }
 0x119   : > { %618 = dma.vmem_to_hbm [thread:$0]  (%p782_p5), %s845_s8, 64, %s843_s11, %s848_s17, %s722_s4, %s722_s4, %s723_s5  }
 0x11a PF: > { %p624_p13 = scmp.ge.s32.totalorder %s719_s15, 2  ;;  %s475_s6 = sand.u32 1, %s707_s12  }
 0x11b   : > { %s476_s7 = scalar_lea.sflag [#allocation4], %s475_s6 }
 0x11c   : > { %p621_p0 = pnand %p624_p13, %p786_p6 }
 0x11e   : > { %p622_p1 = pneg %p621_p0 }
 0x120   : > { %702 = dma.done.wait (%p622_p1), %s476_s7, 64  }
 0x121   : > { %704 = vsyncadd (%p622_p1), %s476_s7, 4294967232  ;;  %p13_p2 = scmp.ge.s32.totalorder %s769_s18, 4   ;;  %s894_s12 = smov %s711_s13 }
 0x122   : > { %s895_s13 = smov %s715_s14  ;;  %s896_s14 = smov %s780_s21 }
 0x123   : > { %s897_s15 = smov %s769_s18  ;;  %15 = sbr.rel (!%p13_p2) target bundleno = 3 (0x3), region = 69 }
 0x128   :  { %481 = vsyncpa [#allocation4], 1 }
 0x129   :  { %483 = vsyncpa [#allocation4 + $0x1], 1 }

</bundles_post_ra>
